<compile_context>
chip_gen: v7x
topology: tpu7x:2x2x1
jax: 0.10.0
libtpu: 0.0.40
codegen_flags: <defaults>
</compile_context>

<pallas_src>
import functools
import math

import jax
import jax.numpy as jnp
from jax.experimental import pallas as pl
from jax.experimental.pallas import tpu as pltpu


def _mm(a, b, cdt):
    # MXU matmul with optional bf16 operands, always f32 accumulation.
    return jnp.dot(a.astype(cdt), b.astype(cdt), preferred_element_type=jnp.float32)


def _dg(a, b, contract, cdt):
    # dot_general with explicit contraction dims (avoids XLU transposes of .T operands).
    return jax.lax.dot_general(
        a.astype(cdt), b.astype(cdt),
        dimension_numbers=(contract, ((), ())),
        preferred_element_type=jnp.float32)


def _att_module_kernel(x3_ref, pm_ref, lm_ref,
                       wf_ref, bf_ref, wqkv_ref, bqkv_ref,
                       wo_ref, bo_ref, w1_ref, b1_ref,
                       out_ref, *, L, cin, c1, c2, c3, alpha, cdt):
    x3 = x3_ref[...]                      # (3*Cin, Lp) stacked conv taps [x[l-d]; x[l]; x[l+d]]
    pm = pm_ref[...]                      # (1, Lp) multiplicative padding mask (0/1, 0 on wrapper pad)
    lm = lm_ref[...]                      # (1, Lp) log(mask+1e-6); -1e30 on wrapper pad
    Lp = x3.shape[-1]

    x = x3[cin:2 * cin, :]                # original input tile (Cin, Lp) (center tap)

    # ---- feed_forward: dilated Conv1d(k=3) as one fused matmul + ReLU -----------------
    ff = _mm(wf_ref[...], x3, cdt) + bf_ref[...]          # (Cout, Lp)
    ff = jnp.maximum(ff, 0.0)

    # ---- InstanceNorm1d (stats over the L valid positions only, eps=1e-5, biased var) --
    valid = (jax.lax.broadcasted_iota(jnp.int32, (1, Lp), 1) < L).astype(jnp.float32)
    inv_L = 1.0 / float(L)
    mean = jnp.sum(ff * valid, axis=-1, keepdims=True) * inv_L
    cent = ff - mean
    var = jnp.sum(cent * cent * valid, axis=-1, keepdims=True) * inv_L
    xn = cent * jax.lax.rsqrt(var + 1e-5)                 # (Cout, Lp)

    # ---- AttLayer 'normal_att' (encoder: q, k, v all from xn) -------------------------
    proj = _mm(wqkv_ref[...], xn, cdt) + bqkv_ref[...]    # (c1+c2+c3, Lp) fused projection
    q = proj[0:c1, :] * (1.0 / math.sqrt(c1))             # pre-scale q, not the (L,L) energy
    k = proj[c1:c1 + c2, :]
    v = proj[c1 + c2:c1 + c2 + c3, :]

    # energy[i, j] = sum_c q[c, i] * k[c, j]   (== q^T @ k, no explicit transpose)
    energy = _dg(q, k, ((0,), (0,)), cdt)                 # (Lp, Lp) f32
    logits = energy + lm                                  # broadcast (1, Lp) over rows
    logits = logits - jnp.max(logits, axis=-1, keepdims=True)
    p = jnp.exp(logits)
    att = p * pl.reciprocal(jnp.sum(p, axis=-1, keepdims=True), approx=False)
    att = att * pm

    # out[c, i] = sum_j v[c, j] * att[i, j]   (== v @ att^T, no explicit transpose)
    out_att = _dg(v, att, ((1,), (1,)), cdt)              # (c3, Lp)
    out_att = jnp.maximum(out_att, 0.0)
    out_att = _mm(wo_ref[...], out_att, cdt) + bo_ref[...]
    out_att = out_att * pm                                # AttLayer final mask

    # ---- AttModule residual / conv_1x1 / final mask ------------------------------------
    h = alpha * out_att + ff
    h = _mm(w1_ref[...], h, cdt) + b1_ref[...]
    # TODO(synk): nn.Dropout() is identity at inference; training-mode dropout not implemented.
    out_ref[...] = ((x + h) * pm).astype(out_ref.dtype)


def att_module_forward(x, f, mask, params, *, dilation, alpha,
                       compute_dtype=jnp.float32):
    """AttModule forward (normal_att, encoder stage) via a fused Pallas kernel.

    x    : (B, C, L) float32
    f    : (B, C, L) float32 (unused: encoder stage)
    mask : (B, 1, L) float32 (0/1)
    """
    # TODO(synk): only stage='encoder' + att_type='normal_att'; decoder value path (f) and
    #             block_att / sliding_att variants are not implemented here.
    del f
    B, Cin, L = x.shape
    wf3, bf = params["wf"], params["bf"]        # (Cout, Cin, 3), (Cout, 1)
    wq, bq = params["wq"], params["bq"]
    wk, bk = params["wk"], params["bk"]
    wv, bv = params["wv"], params["bv"]
    wo, bo = params["wo"], params["bo"]
    w1, b1 = params["w1"], params["b1"]
    Cout = wf3.shape[0]
    assert Cout == Cin, "AttModule residual (x + out) requires in_channels == out_channels"
    c1, c2, c3 = wq.shape[0], wk.shape[0], wv.shape[0]
    d = int(dilation)

    # Lane-dense layout: pad L to a multiple of 128 (wrapper padding is exactly masked out).
    Lp = ((L + 127) // 128) * 128
    pad = Lp - L

    xp = jnp.pad(x, ((0, 0), (0, 0), (0, pad)))
    # Conv taps x[l-d], x[l], x[l+d] built in the wrapper (layout plumbing, zero-padded
    # exactly like PyTorch's padding=dilation), stacked along channels -> one matmul.
    zeros = jnp.zeros((B, Cin, d), xp.dtype)
    x_m = jnp.concatenate([zeros, xp[:, :, :Lp - d]], axis=-1)   # x[l-d]
    x_p = jnp.concatenate([xp[:, :, d:], zeros], axis=-1)        # x[l+d]
    x3 = jnp.concatenate([x_m, xp, x_p], axis=1)                 # (B, 3*Cin, Lp)

    pm = mask[:, 0:1, :].astype(jnp.float32)
    lm = jnp.log(pm + 1e-6)                                      # precomputed once in wrapper
    pmp = jnp.pad(pm, ((0, 0), (0, 0), (0, pad)))
    lmp = jnp.pad(lm, ((0, 0), (0, 0), (0, pad)), constant_values=-1e30)

    # Packed parameters (fewer inputs, fused matmuls).
    wf = jnp.concatenate([wf3[:, :, 0], wf3[:, :, 1], wf3[:, :, 2]], axis=1)  # (Cout, 3*Cin)
    wqkv = jnp.concatenate([wq, wk, wv], axis=0)                              # (c1+c2+c3, Cout)
    bqkv = jnp.concatenate([bq, bk, bv], axis=0)

    kernel = functools.partial(
        _att_module_kernel, L=L, cin=Cin, c1=c1, c2=c2, c3=c3,
        alpha=float(alpha), cdt=compute_dtype)

    def per_batch(b):
        return (b, 0, 0)

    def whole(*_):
        return (0, 0)

    out = pl.pallas_call(
        kernel,
        out_shape=jax.ShapeDtypeStruct((B, Cout, Lp), jnp.float32),
        grid_spec=pltpu.PrefetchScalarGridSpec(
            num_scalar_prefetch=0,
            grid=(B,),
            in_specs=[
                pl.BlockSpec((None, 3 * Cin, Lp), per_batch),    # stacked conv taps
                pl.BlockSpec((None, 1, Lp), per_batch),          # padding mask
                pl.BlockSpec((None, 1, Lp), per_batch),          # log-mask
                pl.BlockSpec((Cout, 3 * Cin), whole),            # wf (packed conv taps)
                pl.BlockSpec((Cout, 1), whole),                  # bf
                pl.BlockSpec((c1 + c2 + c3, Cout), whole),       # wqkv (packed)
                pl.BlockSpec((c1 + c2 + c3, 1), whole),          # bqkv (packed)
                pl.BlockSpec((Cout, c3), whole),                 # wo (conv_out)
                pl.BlockSpec((Cout, 1), whole),                  # bo
                pl.BlockSpec((Cout, Cout), whole),               # w1 (conv_1x1)
                pl.BlockSpec((Cout, 1), whole),                  # b1
            ],
            out_specs=pl.BlockSpec((None, Cout, Lp), per_batch),
        ),
        compiler_params=pltpu.CompilerParams(
            dimension_semantics=("parallel",)),
    )(x3, pmp, lmp, wf, bf, wqkv, bqkv, wo, bo, w1, b1)

    return out[:, :, :L]


def att_module_ref(x, f, mask, params, *, dilation, alpha):
    """Pure-JAX reference mirroring the PyTorch AttModule forward (normal_att, encoder)."""
    del f
    wf3, bf = params["wf"], params["bf"]
    wq, bq = params["wq"], params["bq"]
    wk, bk = params["wk"], params["bk"]
    wv, bv = params["wv"], params["bv"]
    wo, bo = params["wo"], params["bo"]
    w1, b1 = params["w1"], params["b1"]
    d = int(dilation)

    ff = jax.lax.conv_general_dilated(
        x, wf3, window_strides=(1,), padding=[(d, d)], rhs_dilation=(d,),
        dimension_numbers=("NCH", "OIH", "NCH")) + bf[None]
    ff = jnp.maximum(ff, 0.0)

    mean = jnp.mean(ff, axis=-1, keepdims=True)
    var = jnp.var(ff, axis=-1, keepdims=True)
    xn = (ff - mean) / jnp.sqrt(var + 1e-5)

    q = jnp.einsum("oc,bcl->bol", wq, xn) + bq[None]
    k = jnp.einsum("oc,bcl->bol", wk, xn) + bk[None]
    v = jnp.einsum("oc,bcl->bol", wv, xn) + bv[None]

    pm = mask[:, 0:1, :]
    c1 = q.shape[1]
    energy = jnp.einsum("bcq,bck->bqk", q, k) / math.sqrt(c1)
    att = energy + jnp.log(pm + 1e-6)
    att = jax.nn.softmax(att, axis=-1)
    att = att * pm
    out = jnp.einsum("bck,bqk->bcq", v, att)
    out = jnp.maximum(out, 0.0)
    out = jnp.einsum("oc,bcl->bol", wo, out) + bo[None]
    out = out * pm

    h = alpha * out + ff
    h = jnp.einsum("oc,bcl->bol", w1, h) + b1[None]
    return (x + h) * pm


if __name__ == "__main__":
    # AttModule(dilation, in_channels, out_channels, r1, r2, att_type='normal_att',
    #           stage='encoder', alpha)
    B, C, L = 2, 16, 200          # L pads to 256 lanes inside the wrapper
    dilation = 2
    r1, r2 = 2, 2
    c1 = c2 = C // r1
    c3 = C // r2
    alpha = 1.0

    key = jax.random.PRNGKey(0)
    ks = jax.random.split(key, 16)
    s = 0.1
    params = {
        "wf": s * jax.random.normal(ks[0], (C, C, 3), jnp.float32),   # ConvFeedForward conv
        "bf": s * jax.random.normal(ks[1], (C, 1), jnp.float32),
        "wq": s * jax.random.normal(ks[2], (c1, C), jnp.float32),
        "bq": s * jax.random.normal(ks[3], (c1, 1), jnp.float32),
        "wk": s * jax.random.normal(ks[4], (c2, C), jnp.float32),
        "bk": s * jax.random.normal(ks[5], (c2, 1), jnp.float32),
        "wv": s * jax.random.normal(ks[6], (c3, C), jnp.float32),
        "bv": s * jax.random.normal(ks[7], (c3, 1), jnp.float32),
        "wo": s * jax.random.normal(ks[8], (C, c3), jnp.float32),     # AttLayer conv_out
        "bo": s * jax.random.normal(ks[9], (C, 1), jnp.float32),
        "w1": s * jax.random.normal(ks[10], (C, C), jnp.float32),     # AttModule conv_1x1
        "b1": s * jax.random.normal(ks[11], (C, 1), jnp.float32),
    }

    x = jax.random.normal(ks[12], (B, C, L), jnp.float32)
    f = jnp.zeros((B, C, L), jnp.float32)            # unused (encoder stage)
    mask = jnp.ones((B, 1, L), jnp.float32)
    mask = mask.at[1, :, L - 40:].set(0.0)           # batch 1: last 40 frames padded out

    out = att_module_forward(x, f, mask, params, dilation=dilation, alpha=alpha)
    out = jax.block_until_ready(out)
    ref = att_module_ref(x, f, mask, params, dilation=dilation, alpha=alpha)

    assert out.shape == (B, C, L)
    err = float(jnp.max(jnp.abs(out - ref)))
    assert jnp.allclose(out, ref, atol=1e-4, rtol=1e-4), err

    # bf16 MXU-operand path (recommended on v6e/v7x); softmax & accumulation stay f32.
    out_bf16 = att_module_forward(x, f, mask, params, dilation=dilation, alpha=alpha,
                                  compute_dtype=jnp.bfloat16)
    out_bf16 = jax.block_until_ready(out_bf16)
    err_bf16 = float(jnp.max(jnp.abs(out_bf16 - ref)))
    assert err_bf16 < 0.2, err_bf16

    print("KERNEL_OK")
</pallas_src>

<mosaic_0001>
module attributes {stable_mosaic.version = 11 : i64} {
  func.func @_att_module_kernel(%arg0: i32, %arg1: memref<1x48x256xf32, #tpu.memory_space<vmem>>, %arg2: memref<1x1x256xf32, #tpu.memory_space<vmem>>, %arg3: memref<1x1x256xf32, #tpu.memory_space<vmem>>, %arg4: memref<16x48xf32, #tpu.memory_space<vmem>>, %arg5: memref<16x1xf32, #tpu.memory_space<vmem>>, %arg6: memref<24x16xf32, #tpu.memory_space<vmem>>, %arg7: memref<24x1xf32, #tpu.memory_space<vmem>>, %arg8: memref<16x8xf32, #tpu.memory_space<vmem>>, %arg9: memref<16x1xf32, #tpu.memory_space<vmem>>, %arg10: memref<16x16xf32, #tpu.memory_space<vmem>>, %arg11: memref<16x1xf32, #tpu.memory_space<vmem>>, %arg12: memref<1x16x256xf32, #tpu.memory_space<vmem>>) attributes {dimension_semantics = [#tpu.dimension_semantics<parallel>], iteration_bounds = array<i64: 2>, scalar_prefetch = 0 : i64, scratch_operands = 0 : i64, tpu.core_type = #tpu.core_type<tc>, window_params = [{transform_indices = @transform_0, window_bounds = array<i64: 1, 48, 256>}, {transform_indices = @transform_1, window_bounds = array<i64: 1, 1, 256>}, {transform_indices = @transform_2, window_bounds = array<i64: 1, 1, 256>}, {pipeline_mode = #tpu.pipeline_mode<synchronous>, transform_indices = @transform_3, window_bounds = array<i64: 16, 48>}, {pipeline_mode = #tpu.pipeline_mode<synchronous>, transform_indices = @transform_4, window_bounds = array<i64: 16, 1>}, {pipeline_mode = #tpu.pipeline_mode<synchronous>, transform_indices = @transform_5, window_bounds = array<i64: 24, 16>}, {pipeline_mode = #tpu.pipeline_mode<synchronous>, transform_indices = @transform_6, window_bounds = array<i64: 24, 1>}, {pipeline_mode = #tpu.pipeline_mode<synchronous>, transform_indices = @transform_7, window_bounds = array<i64: 16, 8>}, {pipeline_mode = #tpu.pipeline_mode<synchronous>, transform_indices = @transform_8, window_bounds = array<i64: 16, 1>}, {pipeline_mode = #tpu.pipeline_mode<synchronous>, transform_indices = @transform_9, window_bounds = array<i64: 16, 16>}, {pipeline_mode = #tpu.pipeline_mode<synchronous>, transform_indices = @transform_10, window_bounds = array<i64: 16, 1>}, {transform_indices = @transform_11, window_bounds = array<i64: 1, 16, 256>}]} {
    %c0 = arith.constant 0 : index
    %c0_0 = arith.constant 0 : index
    %c0_1 = arith.constant 0 : index
    %0 = vector.load %arg1[%c0, %c0_0, %c0_1] : memref<1x48x256xf32, #tpu.memory_space<vmem>>, vector<1x48x256xf32>
    %1 = vector.shape_cast %0 : vector<1x48x256xf32> to vector<48x256xf32>
    %c0_2 = arith.constant 0 : index
    %c0_3 = arith.constant 0 : index
    %c0_4 = arith.constant 0 : index
    %2 = vector.load %arg2[%c0_2, %c0_3, %c0_4] : memref<1x1x256xf32, #tpu.memory_space<vmem>>, vector<1x1x256xf32>
    %3 = vector.shape_cast %2 : vector<1x1x256xf32> to vector<1x256xf32>
    %c0_5 = arith.constant 0 : index
    %c0_6 = arith.constant 0 : index
    %c0_7 = arith.constant 0 : index
    %4 = vector.load %arg3[%c0_5, %c0_6, %c0_7] : memref<1x1x256xf32, #tpu.memory_space<vmem>>, vector<1x1x256xf32>
    %5 = vector.shape_cast %4 : vector<1x1x256xf32> to vector<1x256xf32>
    %6 = vector.extract_strided_slice %1 {offsets = [16, 0], sizes = [16, 256], strides = [1, 1]} : vector<48x256xf32> to vector<16x256xf32>
    %c0_8 = arith.constant 0 : index
    %c0_9 = arith.constant 0 : index
    %7 = vector.load %arg4[%c0_8, %c0_9] : memref<16x48xf32, #tpu.memory_space<vmem>>, vector<16x48xf32>
    %cst = arith.constant dense<0.000000e+00> : vector<16x256xf32>
    %8 = tpu.matmul %7, %1, %cst {dimension_numbers = #tpu.dot_dimension_numbers<[1], [0], [0], [1], [0, 0, 1, 1], [], []>} : vector<16x48xf32>, vector<48x256xf32>, vector<16x256xf32> -> vector<16x256xf32>
    %c0_10 = arith.constant 0 : index
    %c0_11 = arith.constant 0 : index
    %9 = vector.load %arg5[%c0_10, %c0_11] : memref<16x1xf32, #tpu.memory_space<vmem>>, vector<16x1xf32>
    %10 = vector.broadcast %9 : vector<16x1xf32> to vector<16x256xf32>
    %11 = arith.addf %8, %10 : vector<16x256xf32>
    %cst_12 = arith.constant 0.000000e+00 : f32
    %12 = vector.broadcast %cst_12 : f32 to vector<16x256xf32>
    %13 = arith.maximumf %11, %12 : vector<16x256xf32>
    %14 = tpu.iota {dimensions = array<i32: 1>} : vector<1x256xi32>
    %c200_i32 = arith.constant 200 : i32
    %15 = vector.broadcast %c200_i32 : i32 to vector<1x256xi32>
    %16 = arith.cmpi slt, %14, %15 : vector<1x256xi32>
    %17 = arith.extui %16 : vector<1x256xi1> to vector<1x256xi32>
    %18 = arith.sitofp %17 : vector<1x256xi32> to vector<1x256xf32>
    %19 = vector.broadcast %18 : vector<1x256xf32> to vector<16x256xf32>
    %20 = arith.mulf %13, %19 : vector<16x256xf32>
    %cst_13 = arith.constant dense<0.000000e+00> : vector<16xf32>
    %21 = vector.multi_reduction <add>, %20, %cst_13 [1] : vector<16x256xf32> to vector<16xf32>
    %22 = vector.shape_cast %21 : vector<16xf32> to vector<16x1xf32>
    %cst_14 = arith.constant 5.000000e-03 : f32
    %23 = vector.broadcast %cst_14 : f32 to vector<16x1xf32>
    %24 = arith.mulf %22, %23 : vector<16x1xf32>
    %25 = vector.broadcast %24 : vector<16x1xf32> to vector<16x256xf32>
    %26 = arith.subf %13, %25 : vector<16x256xf32>
    %27 = arith.mulf %26, %26 : vector<16x256xf32>
    %28 = vector.broadcast %18 : vector<1x256xf32> to vector<16x256xf32>
    %29 = arith.mulf %27, %28 : vector<16x256xf32>
    %cst_15 = arith.constant dense<0.000000e+00> : vector<16xf32>
    %30 = vector.multi_reduction <add>, %29, %cst_15 [1] : vector<16x256xf32> to vector<16xf32>
    %31 = vector.shape_cast %30 : vector<16xf32> to vector<16x1xf32>
    %cst_16 = arith.constant 5.000000e-03 : f32
    %32 = vector.broadcast %cst_16 : f32 to vector<16x1xf32>
    %33 = arith.mulf %31, %32 : vector<16x1xf32>
    %cst_17 = arith.constant 9.99999974E-6 : f32
    %34 = vector.broadcast %cst_17 : f32 to vector<16x1xf32>
    %35 = arith.addf %33, %34 : vector<16x1xf32>
    %36 = math.rsqrt %35 : vector<16x1xf32>
    %37 = vector.broadcast %36 : vector<16x1xf32> to vector<16x256xf32>
    %38 = arith.mulf %26, %37 : vector<16x256xf32>
    %c0_18 = arith.constant 0 : index
    %c0_19 = arith.constant 0 : index
    %39 = vector.load %arg6[%c0_18, %c0_19] : memref<24x16xf32, #tpu.memory_space<vmem>>, vector<24x16xf32>
    %cst_20 = arith.constant dense<0.000000e+00> : vector<24x256xf32>
    %40 = tpu.matmul %39, %38, %cst_20 {dimension_numbers = #tpu.dot_dimension_numbers<[1], [0], [0], [1], [0, 0, 1, 1], [], []>} : vector<24x16xf32>, vector<16x256xf32>, vector<24x256xf32> -> vector<24x256xf32>
    %c0_21 = arith.constant 0 : index
    %c0_22 = arith.constant 0 : index
    %41 = vector.load %arg7[%c0_21, %c0_22] : memref<24x1xf32, #tpu.memory_space<vmem>>, vector<24x1xf32>
    %42 = vector.broadcast %41 : vector<24x1xf32> to vector<24x256xf32>
    %43 = arith.addf %40, %42 : vector<24x256xf32>
    %44 = vector.extract_strided_slice %43 {offsets = [0, 0], sizes = [8, 256], strides = [1, 1]} : vector<24x256xf32> to vector<8x256xf32>
    %cst_23 = arith.constant 0.353553385 : f32
    %45 = vector.broadcast %cst_23 : f32 to vector<8x256xf32>
    %46 = arith.mulf %44, %45 : vector<8x256xf32>
    %47 = vector.extract_strided_slice %43 {offsets = [8, 0], sizes = [8, 256], strides = [1, 1]} : vector<24x256xf32> to vector<8x256xf32>
    %48 = vector.extract_strided_slice %43 {offsets = [16, 0], sizes = [8, 256], strides = [1, 1]} : vector<24x256xf32> to vector<8x256xf32>
    %cst_24 = arith.constant dense<0.000000e+00> : vector<256x256xf32>
    %49 = tpu.matmul %46, %47, %cst_24 {dimension_numbers = #tpu.dot_dimension_numbers<[0], [0], [1], [1], [0, 1, 1, 1], [], []>} : vector<8x256xf32>, vector<8x256xf32>, vector<256x256xf32> -> vector<256x256xf32>
    %50 = vector.broadcast %5 : vector<1x256xf32> to vector<256x256xf32>
    %51 = arith.addf %49, %50 : vector<256x256xf32>
    %cst_25 = arith.constant dense<0xFF800000> : vector<256xf32>
    %52 = vector.multi_reduction <maximumf>, %51, %cst_25 [1] : vector<256x256xf32> to vector<256xf32>
    %53 = vector.shape_cast %52 : vector<256xf32> to vector<256x1xf32>
    %54 = vector.broadcast %53 : vector<256x1xf32> to vector<256x256xf32>
    %55 = arith.subf %51, %54 : vector<256x256xf32>
    %56 = math.exp %55 : vector<256x256xf32>
    %cst_26 = arith.constant dense<0.000000e+00> : vector<256xf32>
    %57 = vector.multi_reduction <add>, %56, %cst_26 [1] : vector<256x256xf32> to vector<256xf32>
    %58 = vector.shape_cast %57 : vector<256xf32> to vector<256x1xf32>
    %59 = tpu.reciprocal %58 : vector<256x1xf32> -> vector<256x1xf32>
    %60 = vector.broadcast %59 : vector<256x1xf32> to vector<256x256xf32>
    %61 = arith.mulf %56, %60 : vector<256x256xf32>
    %62 = vector.broadcast %3 : vector<1x256xf32> to vector<256x256xf32>
    %63 = arith.mulf %61, %62 : vector<256x256xf32>
    %cst_27 = arith.constant dense<0.000000e+00> : vector<8x256xf32>
    %64 = tpu.matmul %48, %63, %cst_27 {dimension_numbers = #tpu.dot_dimension_numbers<[1], [1], [0], [0], [0, 0, 1, 0], [], []>} : vector<8x256xf32>, vector<256x256xf32>, vector<8x256xf32> -> vector<8x256xf32>
    %cst_28 = arith.constant 0.000000e+00 : f32
    %65 = vector.broadcast %cst_28 : f32 to vector<8x256xf32>
    %66 = arith.maximumf %64, %65 : vector<8x256xf32>
    %c0_29 = arith.constant 0 : index
    %c0_30 = arith.constant 0 : index
    %67 = vector.load %arg8[%c0_29, %c0_30] : memref<16x8xf32, #tpu.memory_space<vmem>>, vector<16x8xf32>
    %cst_31 = arith.constant dense<0.000000e+00> : vector<16x256xf32>
    %68 = tpu.matmul %67, %66, %cst_31 {dimension_numbers = #tpu.dot_dimension_numbers<[1], [0], [0], [1], [0, 0, 1, 1], [], []>} : vector<16x8xf32>, vector<8x256xf32>, vector<16x256xf32> -> vector<16x256xf32>
    %c0_32 = arith.constant 0 : index
    %c0_33 = arith.constant 0 : index
    %69 = vector.load %arg9[%c0_32, %c0_33] : memref<16x1xf32, #tpu.memory_space<vmem>>, vector<16x1xf32>
    %70 = vector.broadcast %69 : vector<16x1xf32> to vector<16x256xf32>
    %71 = arith.addf %68, %70 : vector<16x256xf32>
    %72 = vector.broadcast %3 : vector<1x256xf32> to vector<16x256xf32>
    %73 = arith.mulf %71, %72 : vector<16x256xf32>
    %cst_34 = arith.constant 1.000000e+00 : f32
    %74 = vector.broadcast %cst_34 : f32 to vector<16x256xf32>
    %75 = arith.mulf %74, %73 : vector<16x256xf32>
    %76 = arith.addf %75, %13 : vector<16x256xf32>
    %c0_35 = arith.constant 0 : index
    %c0_36 = arith.constant 0 : index
    %77 = vector.load %arg10[%c0_35, %c0_36] : memref<16x16xf32, #tpu.memory_space<vmem>>, vector<16x16xf32>
    %cst_37 = arith.constant dense<0.000000e+00> : vector<16x256xf32>
    %78 = tpu.matmul %77, %76, %cst_37 {dimension_numbers = #tpu.dot_dimension_numbers<[1], [0], [0], [1], [0, 0, 1, 1], [], []>} : vector<16x16xf32>, vector<16x256xf32>, vector<16x256xf32> -> vector<16x256xf32>
    %c0_38 = arith.constant 0 : index
    %c0_39 = arith.constant 0 : index
    %79 = vector.load %arg11[%c0_38, %c0_39] : memref<16x1xf32, #tpu.memory_space<vmem>>, vector<16x1xf32>
    %80 = vector.broadcast %79 : vector<16x1xf32> to vector<16x256xf32>
    %81 = arith.addf %78, %80 : vector<16x256xf32>
    %82 = arith.addf %6, %81 : vector<16x256xf32>
    %83 = vector.broadcast %3 : vector<1x256xf32> to vector<16x256xf32>
    %84 = arith.mulf %82, %83 : vector<16x256xf32>
    %c0_40 = arith.constant 0 : index
    %c0_41 = arith.constant 0 : index
    %c0_42 = arith.constant 0 : index
    %85 = vector.load %arg12[%c0_40, %c0_41, %c0_42] : memref<1x16x256xf32, #tpu.memory_space<vmem>>, vector<1x16x256xf32>
    %86 = vector.shape_cast %85 : vector<1x16x256xf32> to vector<16x256xf32>
    %87 = vector.shape_cast %84 : vector<16x256xf32> to vector<1x16x256xf32>
    tpu.vector_store %arg12[%c0_40, %c0_41, %c0_42], %87 {strides = array<i32>} : memref<1x16x256xf32, #tpu.memory_space<vmem>>, vector<1x16x256xf32>,
    return
  }
  func.func @transform_0(%arg0: i32) -> (i32, i32, i32) {
    %c0_i32 = arith.constant 0 : i32
    %c0_i32_0 = arith.constant 0 : i32
    %c0_i32_1 = arith.constant 0 : i32
    return %arg0, %c0_i32, %c0_i32_0 : i32, i32, i32
  }
  func.func @transform_1(%arg0: i32) -> (i32, i32, i32) {
    %c0_i32 = arith.constant 0 : i32
    %c0_i32_0 = arith.constant 0 : i32
    %c0_i32_1 = arith.constant 0 : i32
    return %arg0, %c0_i32, %c0_i32_0 : i32, i32, i32
  }
  func.func @transform_2(%arg0: i32) -> (i32, i32, i32) {
    %c0_i32 = arith.constant 0 : i32
    %c0_i32_0 = arith.constant 0 : i32
    %c0_i32_1 = arith.constant 0 : i32
    return %arg0, %c0_i32, %c0_i32_0 : i32, i32, i32
  }
  func.func @transform_3(%arg0: i32) -> (i32, i32) {
    %c0_i32 = arith.constant 0 : i32
    %c0_i32_0 = arith.constant 0 : i32
    %c0_i32_1 = arith.constant 0 : i32
    return %c0_i32, %c0_i32_0 : i32, i32
  }
  func.func @transform_4(%arg0: i32) -> (i32, i32) {
    %c0_i32 = arith.constant 0 : i32
    %c0_i32_0 = arith.constant 0 : i32
    %c0_i32_1 = arith.constant 0 : i32
    return %c0_i32, %c0_i32_0 : i32, i32
  }
  func.func @transform_5(%arg0: i32) -> (i32, i32) {
    %c0_i32 = arith.constant 0 : i32
    %c0_i32_0 = arith.constant 0 : i32
    %c0_i32_1 = arith.constant 0 : i32
    return %c0_i32, %c0_i32_0 : i32, i32
  }
  func.func @transform_6(%arg0: i32) -> (i32, i32) {
    %c0_i32 = arith.constant 0 : i32
    %c0_i32_0 = arith.constant 0 : i32
    %c0_i32_1 = arith.constant 0 : i32
    return %c0_i32, %c0_i32_0 : i32, i32
  }
  func.func @transform_7(%arg0: i32) -> (i32, i32) {
    %c0_i32 = arith.constant 0 : i32
    %c0_i32_0 = arith.constant 0 : i32
    %c0_i32_1 = arith.constant 0 : i32
    return %c0_i32, %c0_i32_0 : i32, i32
  }
  func.func @transform_8(%arg0: i32) -> (i32, i32) {
    %c0_i32 = arith.constant 0 : i32
    %c0_i32_0 = arith.constant 0 : i32
    %c0_i32_1 = arith.constant 0 : i32
    return %c0_i32, %c0_i32_0 : i32, i32
  }
  func.func @transform_9(%arg0: i32) -> (i32, i32) {
    %c0_i32 = arith.constant 0 : i32
    %c0_i32_0 = arith.constant 0 : i32
    %c0_i32_1 = arith.constant 0 : i32
    return %c0_i32, %c0_i32_0 : i32, i32
  }
  func.func @transform_10(%arg0: i32) -> (i32, i32) {
    %c0_i32 = arith.constant 0 : i32
    %c0_i32_0 = arith.constant 0 : i32
    %c0_i32_1 = arith.constant 0 : i32
    return %c0_i32, %c0_i32_0 : i32, i32
  }
  func.func @transform_11(%arg0: i32) -> (i32, i32, i32) {
    %c0_i32 = arith.constant 0 : i32
    %c0_i32_0 = arith.constant 0 : i32
    %c0_i32_1 = arith.constant 0 : i32
    return %arg0, %c0_i32, %c0_i32_0 : i32, i32, i32
  }
}

</mosaic_0001>

<bundles_post_ra>
// kernel: tpu_custom_call.1
= control target key start
LH: loop header
LB: loop body
LE: loop exit
PB: predicated region body
PF: predicated region fallthrough
CT: control target
= control target key end

     0   :  { %16 = vsyncpa [#allocation3], 0  ;;  %s3714_s0 = inlined_call_operand.hbm [shape: f32[2,48,256], index: 0, kind: input, shape index: {}]   ;;  %s3715_s1 = inlined_call_operand.vmem [shape: f32[2,1,256], index: 1, kind: input, shape index: {}]   ;;  %s3716_s2 = inlined_call_operand.vmem [shape: f32[2,1,256], index: 2, kind: input, shape index: {}]   ;;  %s3717_s3 = inlined_call_operand.vmem [shape: f32[16,48], index: 3, kind: input, shape index: {}]   ;;  %s3718_s4 = inlined_call_operand.vmem [shape: f32[16,1], index: 4, kind: input, shape index: {}]   ;;  %s3719_s5 = inlined_call_operand.vmem [shape: f32[24,16], index: 5, kind: input, shape index: {}]   ;;  %s3720_s6 = inlined_call_operand.vmem [shape: f32[24,1], index: 6, kind: input, shape index: {}]   ;;  %s3721_s7 = inlined_call_operand.vmem [shape: f32[16,8], index: 7, kind: input, shape index: {}]   ;;  %s3722_s8 = inlined_call_operand.vmem [shape: f32[16,1], index: 8, kind: input, shape index: {}]   ;;  %s3723_s9 = inlined_call_operand.vmem [shape: f32[16,16], index: 9, kind: input, shape index: {}]   ;;  %s3724_s10 = inlined_call_operand.vmem [shape: f32[16,1], index: 10, kind: input, shape index: {}]   ;;  %s3725_s11 = inlined_call_operand.hbm [shape: f32[2,16,256], index: 11, kind: output, shape index: {}]  }
   0x1   :  { %18 = vsyncpa [#allocation3 + $0x1], 0 }
   0x2   :  { %19 = vsyncpa [#allocation4], 0 }
   0x3   :  { %21 = vsyncpa [#allocation4 + $0x1], 0  ;;  %s2665_s17 = smov 0   ;;  %s2667_s18 = smov 0  }
   0x4   :  { %s2669_s19 = smov 0   ;;  %s2671_s20 = smov 0  }
   0x5 LB: > { %3769 = sst [smem:[#allocation8_spill]] %s2591_s19  ;;  %s2686_s21 = sadd.s32 4294967295, %s2595_s20   ;;  %s2595_s20 = sphi %s2671_s20, %s3858_s20   ;;  %s2591_s19 = sphi %s2669_s19, %s3860_s19   ;;  %s2587_s18 = sphi %s2667_s18, %s3862_s18   ;;  %s2583_s17 = sphi %s2665_s17, %s3861_s17  }
   0x6   : > { %s2102_s22 = sadd.s32 4294967294, %s2595_s20   ;;  %s2690_s23 = sadd.s32 1, %s2595_s20  }
   0x7   : > { %3770 = sst [smem:[#allocation9_spill]] %s2690_s23  ;;  %s34_s24 = sadd.s32 1, %s2591_s19 }
   0x8   : > { %s31_s25 = ssub.s32 %s2595_s20, %s2690_s23  ;;  %p41_p0 = scmp.ne.s32.totalorder %s2591_s19, %s2587_s18 }
   0x9   : > { %p32_p1 = scmp.eq.s32.totalorder %s31_s25, 0  ;;  %p42_p2 = scmp.eq.s32.totalorder %s2595_s20, 0 }
   0xa   : > { %p47_p3 = scmp.ne.s32.totalorder %s2587_s18, %s2583_s17  ;;  %p48_p4 = scmp.eq.s32.totalorder %s2686_s21, 0 }
   0xb   : > { %s2702_s26 = scalar_select %p32_p1, %s2591_s19, %s34_s24  }
   0xc   : > { %p43_p5 = por %p42_p2, %p41_p0  ;;  %p2704_p6 = por %p48_p4, %p47_p3 }
   0xd   : > { %3771 = sst [smem:[#allocation10_spill]] %s2702_s26  ;;  %p291_p7 = scmp.eq.s32.totalorder %s2686_s21, 1 }
   0xe   : > { %p297_p8 = scmp.eq.s32.totalorder %s2102_s22, 1  ;;  %p2257_p10 = scmp.lt.s32.totalorder %s2595_s20, 2 }
   0xf   : > { %p2711_p11 = por %p291_p7, %p41_p0  ;;  %s341_s30 = sand.u32 1, %s2591_s19  }
  0x10   : > { %p2715_p12 = por %p297_p8, %p47_p3  ;;  %s2243_s12 = smul.u32 1536, %s2595_s20 }
  0x11   : > { %s3773_s28 = scalar_select %p2711_p11, 1, 0 }
  0x12   : > { %s3774_s29 = scalar_select %p2715_p12, 1, 0 }
  0x13   : > { %s2242_s13 = smul.u32 96, %s341_s30  ;;  %s2724_s16 = scalar_lea.hbm %s3714_s0, %s2243_s12 }
  0x14   : > { %3775 = sst [smem:[#allocation11_spill]] %s3774_s29  ;;  %p2726_p13 = pnand %p2257_p10, %p43_p5 }
  0x15   : > { %s345_s24 = scalar_lea.vmem [#allocation2], %s2242_s13  ;;  %s2732_s26 = scalar_lea.sflag [#allocation3], %s341_s30 }
  0x16   : > { %s352_s25 = sshll.u32 %s345_s24, 4  ;;  %s2499_s19 = scalar_lea.hbm %s2724_s16, 1536  ;;  %s2730_s25 = int_to_ptr.vmem [resolvable:$true] %s352_s25 }
  0x17   : > { %p2500_p0 = scmp.ne.s32.totalorder %s2724_s16, %s2499_s19  ;;  %p2501_p1 = pneg %p2726_p13 }
  0x18   : > { %s2504_s15 = scalar_lea.hbm %s3714_s0, 3072  ;;  %p2505_p4 = scmp.lt.u32.totalorder %s2724_s16, %s3714_s0 }
  0x19   : > { %p2502_p2 = pnand %p2501_p1, %p2500_p0  ;;  %p2506_p5 = scmp.lt.u32.totalorder %s2504_s15, %s2499_s19 }
  0x1a   : > { %p2508_p8 = scmp.lt.u32.totalorder %s2499_s19, %s2724_s16 }
  0x1b   : > { %p2503_p3 = pneg %p2502_p2  ;;  %p2507_p7 = por %p2506_p5, %p2505_p4 }
  0x1d   : > { %p2509_p10 = por %p2508_p8, %p2507_p7 }
  0x1f   : > { %p2510_p9 = pnand %p2509_p10, %p2503_p3 }
  0x21   : > { %2513 = shalt.err (!%p2510_p9)
}
  0x22   : > { %s2514_s30 = scalar_lea.vmem %s2730_s25, 1536  ;;  %s2597_s13 = smov [#allocation2]  }
  0x23   : > { %p2515_p0 = scmp.ne.s32.totalorder %s2730_s25, %s2514_s30  ;;  %s2519_s24 = sshll.u32 %s2597_s13, 4  ;;  %s2520_s24 = int_to_ptr.vmem [resolvable:$false] %s2519_s24 }
  0x24   : > { %s2521_s23 = scalar_lea.vmem %s2520_s24, 3072  ;;  %p2522_p11 = scmp.lt.s32.totalorder %s2730_s25, %s2520_s24 }
  0x25   : > { %p2517_p2 = pnand %p2515_p0, %p2501_p1  ;;  %p2523_p4 = scmp.lt.s32.totalorder %s2521_s23, %s2514_s30 }
  0x27   : > { %p2518_p12 = pneg %p2517_p2  ;;  %p2524_p5 = por %p2523_p4, %p2522_p11 }
  0x29   : > { %p2525_p7 = pnand %p2524_p5, %p2518_p12 }
  0x2b   : > { %2528 = shalt.err (!%p2525_p7)
}
  0x2c   : > { %s2598_s19 = smov 256   ;;  %s2599_s29 = smov 16  }
  0x2d   : > { %2252 = dma.hbm_to_vmem [thread:$0]  (!%p2726_p13), %s2724_s16, 1536, %s2730_s25, %s2732_s26, %s2598_s19, %s2598_s19, %s2599_s29  }
  0x2e   : > { %p2106_p9 = scmp.ge.s32.totalorder %s2595_s20, 1  ;;  %p374_p1 = scmp.lt.s32.totalorder %s2595_s20, 3 }
  0x30   : > { %p375_p3 = pnand %p2106_p9, %p374_p1 }
  0x32   : > { %378 = sbr.rel (%p375_p3) target bundleno = 2385 (0x951), region = 64 }
  0x39   : > { %s2763_s12 = sand.u32 1, %s2587_s18  }
  0x3a   : > { %s2244_s14 = smul.u32 96, %s2763_s12  ;;  %s381_s15 = scalar_lea.sflag [#allocation3], %s2763_s12 }
  0x3c   : > { %s2767_s30 = scalar_lea.vmem [#allocation2], %s2244_s14 }
  0x3d   : > { %2574 = dma.done.wait (%p2704_p6), %s381_s15, 1536  }
  0x3e   : > { %2576 = vsyncadd (%p2704_p6), %s381_s15, 4294965760  ;;  %v3731_v0 = vmov 0.0   ;;  %v2601_v1 = vmov 0   ;;  %v440_v2 = vld [vmem:[%s2767_s30 + $0x8] sm:$0xff]  ;;  %v442_v3 = vld [vmem:[%s2767_s30 + $0x18] sm:$0xff]  ;;  %vm467_vm0 = vcmask 392192   ;;  %v555_v24 = vlaneseq }
  0x3f   : > { %538 = vmatprep.mubr.f32.mxu0 %v3731_v0  ;;  %2297 = vset.pattern.permute.xlu0 %v2601_v1  ;;  %v439_v4 = vld [vmem:[%s2767_s30] sm:$0xff]  ;;  %v2158_v5 = vpack.c.bf16 %v442_v3, %v440_v2  ;;  %v441_v6 = vld [vmem:[%s2767_s30 + $0x10] sm:$0xff]  ;;  %v444_v7 = vld [vmem:[%s2767_s30 + $0x28] sm:$0xff]  ;;  %p431_p6 = scmp.lt.s32.totalorder %s2686_s21, 1  ;;  %vm625_vm2 = vcmask 130048   ;;  %vm795_vm3 = vcmask 64512  }
  0x40   : > { %699 = vmatprep.mubr.f32.mxu1 %v3731_v0  ;;  %2298 = vset.pattern.permute.xlu1 %v2601_v1  ;;  %v446_v8 = vld [vmem:[%s2767_s30 + $0x38] sm:$0xff]  ;;  %v2160_v9 = vpack.c.bf16 %v441_v6, %v439_v4  ;;  %v443_v11 = vld [vmem:[%s2767_s30 + $0x20] sm:$0xff]  ;;  %v445_v12 = vld [vmem:[%s2767_s30 + $0x30] sm:$0xff]  ;;  %v2801_v25 = vshrl.u32 %v555_v24, 7  ;;  %v556_v31 = vand.u32 127, %v555_v24  ;;  %s2107_s14 = sshll.u32 %s2763_s12, 5 }
  0x41   : > { %v2162_v10 = vpack.c.bf16 %v446_v8, %v444_v7  ;;  %v448_v13 = vld [vmem:[%s2767_s30 + $0x48] sm:$0xff]  ;;  %2159 = vmatprep.subr.bf16.mxu0 %v2158_v5  ;;  %v450_v14 = vld [vmem:[%s2767_s30 + $0x58] sm:$0xff]  ;;  %v2164_v15 = vpack.c.bf16 %v445_v12, %v443_v11  ;;  %v455_v16 = vld [vmem:[%s3718_s4] sm:$0xff]  ;;  %s2804_s19 = scalar_select %p431_p6, %s2686_s21, 1 }
  0x42   : > { %2161 = vmatpush1.bf16.msra.mxu0 %v2160_v9  ;;  %v2166_v17 = vpack.c.bf16 %v450_v14, %v448_v13  ;;  %v447_v18 = vld [vmem:[%s2767_s30 + $0x40] sm:$0xff]  ;;  %v449_v19 = vld [vmem:[%s2767_s30 + $0x50] sm:$0xff]  ;;  %459 = vperm.xlu0 %2297, %v455_v16   ;;  %v456_v20 = vld [vmem:[%s3718_s4 + $0x8] sm:$0xff]  ;;  %v723_v26 = vsub.s32 0, %v2801_v25  ;;  %v727_v27 = vsub.s32 1, %v2801_v25  ;;  %v557_v32 = vadd.s32 128, %v556_v31 }
  0x43   : > { %2163 = vmatprep.subr.bf16.mxu0 %v2162_v10  ;;  %v2168_v21 = vpack.c.bf16 %v449_v19, %v447_v18  ;;  %v453_v22 = vld [vmem:[%s3717_s3] sm:$0xff]  ;;  %v454_v23 = vld [vmem:[%s3717_s3 + $0x8] sm:$0xff]  ;;  %s2108_s29 = sshll.u32 %s2804_s19, 1  ;;  %s430_s15 = scalar_lea.vmem [#allocation5], %s2107_s14 }
  0x44   : > { %s434_s26 = scalar_lea.vmem %s3715_s1, %s2108_s29  ;;  %vm559_vm1 = vcmp.lt.s32.totalorder %v557_v32, 200  ;;  %v607_v5 = vld [vmem:[%s3720_s6] sm:$0xff]  ;;  %v608_v6 = vld [vmem:[%s3720_s6 + $0x8] sm:$0xff]  ;;  %s438_s22 = scalar_lea.vmem %s3716_s2, %s2108_s29 }
  0x45   : > { %v451_v28 = vld [vmem:[%s434_s26] sm:$0x3]  ;;  %v2112_v38 = vsel %vm559_vm1, 1.0, %v3731_v0  ;;  %s2005_s26 = sshll.u32 %s430_s15, 4  ;;  %s2157_s27 = sshll.u32 %s2686_s21, 9  ;;  %s3662_s26 = int_to_ptr.vmem [resolvable:$true] %s2005_s26 }
  0x46   : > { %2165 = vmatpush1.bf16.msra.mxu0 %v2164_v15  ;;  %464 = vperm.xlu0 %2297, %v456_v20   ;;  %v2816_v29 = vrot.slane %v451_v28, %v723_v26  ;;  %v2820_v30 = vrot.slane %v451_v28, %v727_v27  ;;  %s3669_s19 = scalar_lea.hbm %s3725_s11, %s2157_s27  ;;  %s1992_s21 = scalar_lea.sflag [#allocation4], %s2763_s12 }
  0x47   : > { %2167 = vmatprep.subr.bf16.mxu0 %v2166_v17  ;;  %s2529_s29 = scalar_lea.vmem %s3662_s26, 512  ;;  %p3854_p12 = scmp.ne.s32.totalorder %s3773_s28, 0 }
  0x48   : > { %3777 = vst [vmem:[#allocation12_spill] sm:$0xff] %v2816_v29  ;;  %3778 = vst [vmem:[#allocation13_spill] sm:$0xff] %v2820_v30  ;;  %p2530_p11 = scmp.ne.s32.totalorder %s3662_s26, %s2529_s29 }
  0x4a   : > { %2169 = vmatpush1.bf16.msra.mxu0 %v2168_v21  ;;  %v604_v21 = vld [vmem:[%s3719_s5] sm:$0xff]  ;;  %p2531_p13 = pnand %p2530_p11, %p3854_p12 }
  0x4c   : > { %p2532_p8 = pneg %p2531_p13 }
  0x4d   : > { %2110 = vmatmul.mubr.msk.f32.vlgmr.msra.gmra.mrb[0].mxu0 %vm467_vm0, %v453_v22  ;;  %v605_v22 = vld [vmem:[%s3719_s5 + $0x8] sm:$0xff] }
  0x4e   : > { %544 = vmatprep.mubr.f32.mxu0 %v3731_v0 }
  0x51   : > { %2111 = vmatmul.mubr.msk.f32.gmra.mrb[2].mxu0 %vm467_vm0, %v454_v23  ;;  %v606_v23 = vld [vmem:[%s3719_s5 + $0x10] sm:$0xff] }
  0xc1   : > { %v460_v33 = vpop.permute.xlu0 %459 }
  0xc5   : > { %v465_v41 = vpop.permute.xlu0 %464 }
 0x120   : > { %v540_v34 = vpop.f32.mrb[0].mxu0 }
 0x121   : > { %v542_v35 = vpop.f32.mrb[1].mxu0  ;;  %v541_v36 = vadd.f32 %v540_v34, %v460_v33 }
 0x122   : > { %v543_v37 = vadd.f32 %v542_v35, %v460_v33 }
 0x123   : > { %v2825_v43 = vmax.f32 %v541_v36, 0.0 }
 0x124   : > { %v2823_v39 = vmax.f32 %v543_v37, 0.0  ;;  %v546_v40 = vpop.f32.mrb[2].mxu0 }
 0x125   : > { %v548_v42 = vpop.f32.mrb[3].mxu0  ;;  %3780 = vst [vmem:[#allocation15_spill] sm:$0xff] %v2825_v43  ;;  %v547_v44 = vadd.f32 %v546_v40, %v465_v41 }
 0x126   : > { %3779 = vst [vmem:[#allocation14_spill] sm:$0xff] %v2823_v39  ;;  %v549_v45 = vadd.f32 %v548_v42, %v465_v41  ;;  %v565_v46 = vmul.f32 %v2112_v38, %v2823_v39 }
 0x127   : > { %v2831_v49 = vmax.f32 %v547_v44, 0.0 }
 0x128   : > { %v2828_v47 = vmax.f32 %v549_v45, 0.0  ;;  %v568_v48 = vadd.f32 %v565_v46, %v2825_v43 }
 0x129   : > { %3782 = vst [vmem:[#allocation17_spill] sm:$0xff] %v2831_v49 }
 0x12a   : > { %3781 = vst [vmem:[#allocation16_spill] sm:$0xff] %v2828_v47  ;;  %569 = vadd.xlane.f32.xlu1 %v568_v48  ;;  %v567_v50 = vmul.f32 %v2112_v38, %v2828_v47 }
 0x12c   : > { %v571_v51 = vadd.f32 %v567_v50, %v2831_v49 }
 0x12e   : > { %572 = vadd.xlane.f32.xlu1 %v571_v51 }
 0x1b7   : > { %v570_v52 = vpop.xlane.xlu1 %569 }
 0x1b8   : > { %v574_v53 = vmul.f32 0.005, %v570_v52 }
 0x1ba   : > { %v576_v54 = vsub.f32 %v2825_v43, %v574_v53  ;;  %v577_v55 = vsub.f32 %v2823_v39, %v574_v53 }
 0x1bb   : > { %v573_v56 = vpop.xlane.xlu1 %572 }
 0x1bc   : > { %v575_v57 = vmul.f32 0.005, %v573_v56  ;;  %v581_v58 = vmul.f32 %v577_v55, %v577_v55  ;;  %v580_v61 = vmul.f32 %v576_v54, %v576_v54 }
 0x1be   : > { %v578_v59 = vsub.f32 %v2831_v49, %v575_v57  ;;  %v579_v60 = vsub.f32 %v2828_v47, %v575_v57  ;;  %v585_v62 = vmul.f32 %v2112_v38, %v581_v58 }
 0x1c0   : > { %v588_v63 = vadd.f32 %v585_v62, %v580_v61  ;;  %v583_v1 = vmul.f32 %v579_v60, %v579_v60  ;;  %v582_v2 = vmul.f32 %v578_v59, %v578_v59 }
 0x1c2   : > { %589 = vadd.xlane.f32.xlu0 %v588_v63  ;;  %v587_v3 = vmul.f32 %v2112_v38, %v583_v1 }
 0x1c4   : > { %v591_v4 = vadd.f32 %v587_v3, %v582_v2 }
 0x1c6   : > { %592 = vadd.xlane.f32.xlu1 %v591_v4 }
 0x1d7   : > { %612 = vperm.xlu1 %2298, %v607_v5  }
 0x1db   : > { %617 = vperm.xlu1 %2298, %v608_v6  }
 0x24f   : > { %v590_v7 = vpop.xlane.xlu0 %589 }
 0x250   : > { %v594_v8 = vmul.f32 0.005, %v590_v7 }
 0x252   : > { %v596_v9 = vadd.f32 1e-05, %v594_v8 }
 0x253   : > { %v593_v10 = vpop.xlane.xlu1 %592 }
 0x254   : > { %v595_v11 = vmul.f32 0.005, %v593_v10  ;;  %2299 = vrsqrt.f32 %v596_v9 }
 0x256   : > { %v597_v12 = vadd.f32 1e-05, %v595_v11 }
 0x257   : > { %v613_v24 = vpop.permute.xlu1 %612 }
 0x258   : > { %2301 = vrsqrt.f32 %v597_v12 }
 0x25b   : > { %v618_v37 = vpop.permute.xlu1 %617 }
 0x25e   : > { %v2300_v13 = vpop.eup %2299 }
 0x25f   : > { %v601_v15 = vmul.f32 %v2300_v13, %v577_v55  ;;  %v600_v17 = vmul.f32 %v2300_v13, %v576_v54 }
 0x262   : > { %v2302_v14 = vpop.eup %2301 }
 0x263   : > { %v603_v16 = vmul.f32 %v2302_v14, %v579_v60  ;;  %v602_v18 = vmul.f32 %v2302_v14, %v578_v59 }
 0x265   : > { %v2170_v19 = vpack.c.bf16 %v603_v16, %v601_v15  ;;  %v2172_v20 = vpack.c.bf16 %v602_v18, %v600_v17  ;;  %v452_v16 = vld [vmem:[%s438_s22] sm:$0x3] }
 0x266   : > { %v2935_v17 = vrot.slane %v452_v16, %v723_v26  ;;  %v2939_v18 = vrot.slane %v452_v16, %v727_v27 }
 0x267   : > { %2171 = vmatprep.subr.bf16.mxu1 %v2170_v19 }
 0x268   : > { %2173 = vmatpush1.bf16.msra.mxu1 %v2172_v20 }
 0x26b   : > { %2113 = vmatmul.mubr.msk.f32.vlgmr.msra.gmra.mrb[0].mxu1 %vm625_vm2, %v604_v21 }
 0x26c   : > { %705 = vmatprep.mubr.f32.mxu1 %v3731_v0 }
 0x26f   : > { %2114 = vmatmul.mubr.msk.f32.gmra.mrb[2].mxu1 %vm625_vm2, %v605_v22 }
 0x270   : > { %711 = vmatprep.mubr.f32.mxu1 %v3731_v0 }
 0x273   : > { %2115 = vmatmul.mubr.msk.f32.gmra.mrb[4].mxu1 %vm625_vm2, %v606_v23 }
 0x274   : > { %956 = vmatprep.mubr.f32.mxu1 %v3731_v0 }
 0x33e   : > { %v701_v28 = vpop.f32.mrb[0].mxu1 }
 0x33f   : > { %v702_v31 = vadd.f32 %v701_v28, %v613_v24  ;;  %v703_v32 = vpop.f32.mrb[1].mxu1 }
 0x340   : > { %v704_v33 = vadd.f32 %v703_v32, %v613_v24 }
 0x341   : > { %v718_v34 = vmul.f32 0.35355338, %v702_v31 }
 0x342   : > { %v719_v35 = vmul.f32 0.35355338, %v704_v33  ;;  %v707_v36 = vpop.f32.mrb[2].mxu1 }
 0x343   : > { %v709_v38 = vpop.f32.mrb[3].mxu1  ;;  %731 = vxpose.xlu1.b32.start.end [1/1] (short) %v718_v34, 128  ;;  %v708_v41 = vadd.f32 %v707_v36, %v618_v37 }
 0x344   : > { %v710_v40 = vadd.f32 %v709_v38, %v618_v37  ;;  %763 = vxpose.xlu0.b32.start.end [1/1] (short) %v719_v35, 128 }
 0x346   : > { %892 = vmatprep.subr.mxu1 %v710_v40  ;;  %v2860_v42 = vpop.f32.mrb[4].mxu1 }
 0x347   : > { %893 = vmatpush1.msra.mxu1 %v708_v41  ;;  %3783 = vst [vmem:[#allocation18_spill] sm:$0xff] %v2860_v42  ;;  %v2862_v44 = vpop.f32.mrb[5].mxu1 }
 0x348   : > { %3784 = vst [vmem:[#allocation19_spill] sm:$0xff] %v2862_v44 }
 0x3c3   : > { %v747_v45 = vpop.trf.xlu1 }
 0x3c4   : > { %2116 = vmatmul.mubr.msk.f32.vlgmr.msra.gmra.mrb[6].mxu1 %vm795_vm3, %v747_v45  ;;  %v779_v56 = vpop.trf.xlu0 }
 0x3c5   : > { %962 = vmatprep.mubr.f32.mxu1 %v3731_v0 }
 0x3c7   : > { %v748_v46 = vpop.trf.xlu1 }
 0x3c8   : > { %2117 = vmatmul.mubr.msk.f32.gmra.mrb[8].mxu1 %vm795_vm3, %v748_v46  ;;  %v780_v59 = vpop.trf.xlu0 }
 0x3c9   : > { %968 = vmatprep.mubr.f32.mxu1 %v3731_v0 }
 0x3cb   : > { %v749_v48 = vpop.trf.xlu1 }
 0x3cc   : > { %2118 = vmatmul.mubr.msk.f32.gmra.mrb[10].mxu1 %vm795_vm3, %v749_v48  ;;  %v781_v61 = vpop.trf.xlu0 }
 0x3cd   : > { %974 = vmatprep.mubr.f32.mxu1 %v3731_v0 }
 0x3cf   : > { %v750_v50 = vpop.trf.xlu1 }
 0x3d0   : > { %2119 = vmatmul.mubr.msk.f32.gmra.mrb[12].mxu1 %vm795_vm3, %v750_v50  ;;  %v782_v1 = vpop.trf.xlu0 }
 0x3d1   : > { %980 = vmatprep.mubr.f32.mxu1 %v3731_v0 }
 0x3d3   : > { %v751_v51 = vpop.trf.xlu1 }
 0x3d4   : > { %2120 = vmatmul.mubr.msk.f32.gmra.mrb[14].mxu1 %vm795_vm3, %v751_v51  ;;  %v783_v3 = vpop.trf.xlu0 }
 0x3d5   : > { %986 = vmatprep.mubr.f32.mxu1 %v3731_v0 }
 0x3d7   : > { %v752_v52 = vpop.trf.xlu1 }
 0x3d8   : > { %2121 = vmatmul.mubr.msk.f32.gmra.mrb[16].mxu1 %vm795_vm3, %v752_v52  ;;  %v784_v5 = vpop.trf.xlu0 }
 0x3d9   : > { %992 = vmatprep.mubr.f32.mxu1 %v3731_v0 }
 0x3db   : > { %v753_v53 = vpop.trf.xlu1 }
 0x3dc   : > { %2122 = vmatmul.mubr.msk.f32.gmra.mrb[18].mxu1 %vm795_vm3, %v753_v53  ;;  %v785_v6 = vpop.trf.xlu0 }
 0x3dd   : > { %998 = vmatprep.mubr.f32.mxu1 %v3731_v0 }
 0x3df   : > { %v754_v54 = vpop.trf.xlu1 }
 0x3e0   : > { %2123 = vmatmul.mubr.msk.f32.gmra.mrb[20].mxu1 %vm795_vm3, %v754_v54  ;;  %v786_v7 = vpop.trf.xlu0 }
 0x3e1   : > { %1004 = vmatprep.mubr.f32.mxu1 %v3731_v0 }
 0x3e3   : > { %v755_v55 = vpop.trf.xlu1 }
 0x3e4   : > { %2124 = vmatmul.mubr.msk.f32.gmra.mrb[22].mxu1 %vm795_vm3, %v755_v55  ;;  %v787_v8 = vpop.trf.xlu0 }
 0x3e5   : > { %1010 = vmatprep.mubr.f32.mxu1 %v3731_v0 }
 0x3e7   : > { %v756_v57 = vpop.trf.xlu1 }
 0x3e8   : > { %2125 = vmatmul.mubr.msk.f32.gmra.mrb[24].mxu1 %vm795_vm3, %v756_v57  ;;  %v788_v9 = vpop.trf.xlu0 }
 0x3e9   : > { %1016 = vmatprep.mubr.f32.mxu1 %v3731_v0 }
 0x3eb   : > { %v757_v58 = vpop.trf.xlu1 }
 0x3ec   : > { %2126 = vmatmul.mubr.msk.f32.gmra.mrb[26].mxu1 %vm795_vm3, %v757_v58  ;;  %v789_v10 = vpop.trf.xlu0 }
 0x3ed   : > { %1022 = vmatprep.mubr.f32.mxu1 %v3731_v0 }
 0x3ef   : > { %v758_v60 = vpop.trf.xlu1 }
 0x3f0   : > { %2127 = vmatmul.mubr.msk.f32.gmra.mrb[28].mxu1 %vm795_vm3, %v758_v60  ;;  %v790_v11 = vpop.trf.xlu0 }
 0x3f1   : > { %1028 = vmatprep.mubr.f32.mxu1 %v3731_v0 }
 0x3f3   : > { %v759_v62 = vpop.trf.xlu1 }
 0x3f4   : > { %2128 = vmatmul.mubr.msk.f32.gmra.mrb[30].mxu1 %vm795_vm3, %v759_v62  ;;  %v791_v12 = vpop.trf.xlu0 }
 0x3f5   : > { %1034 = vmatprep.mubr.f32.mxu1 %v3731_v0 }
 0x3f7   : > { %v760_v63 = vpop.trf.xlu1 }
 0x3f8   : > { %2129 = vmatmul.mubr.msk.f32.gmra.mrb[32].mxu1 %vm795_vm3, %v760_v63  ;;  %v792_v13 = vpop.trf.xlu0 }
 0x3f9   : > { %1040 = vmatprep.mubr.f32.mxu1 %v3731_v0 }
 0x3fb   : > { %v761_v2 = vpop.trf.xlu1 }
 0x3fc   : > { %2130 = vmatmul.mubr.msk.f32.gmra.mrb[34].mxu1 %vm795_vm3, %v761_v2  ;;  %v793_v14 = vpop.trf.xlu0 }
 0x3fd   : > { %1046 = vmatprep.mubr.f32.mxu1 %v3731_v0 }
 0x3ff   : > { %v762_v4 = vpop.trf.xlu1 }
 0x400   : > { %2131 = vmatmul.mubr.msk.f32.gmra.mrb[36].mxu1 %vm795_vm3, %v762_v4  ;;  %v794_v15 = vpop.trf.xlu0 }
 0x401   : > { %1052 = vmatprep.mubr.f32.mxu1 %v3731_v0 }
 0x404   : > { %2132 = vmatmul.mubr.msk.f32.gmra.mrb[38].mxu1 %vm795_vm3, %v779_v56 }
 0x405   : > { %1058 = vmatprep.mubr.f32.mxu1 %v3731_v0 }
 0x408   : > { %2133 = vmatmul.mubr.msk.f32.gmra.mrb[40].mxu1 %vm795_vm3, %v780_v59 }
 0x409   : > { %1064 = vmatprep.mubr.f32.mxu1 %v3731_v0 }
 0x40c   : > { %2134 = vmatmul.mubr.msk.f32.gmra.mrb[42].mxu1 %vm795_vm3, %v781_v61 }
 0x40d   : > { %1070 = vmatprep.mubr.f32.mxu1 %v3731_v0 }
 0x410   : > { %2135 = vmatmul.mubr.msk.f32.gmra.mrb[44].mxu1 %vm795_vm3, %v782_v1 }
 0x411   : > { %1076 = vmatprep.mubr.f32.mxu1 %v3731_v0 }
 0x414   : > { %2136 = vmatmul.mubr.msk.f32.gmra.mrb[46].mxu1 %vm795_vm3, %v783_v3 }
 0x415   : > { %1082 = vmatprep.mubr.f32.mxu1 %v3731_v0 }
 0x418   : > { %2137 = vmatmul.mubr.msk.f32.gmra.mrb[48].mxu1 %vm795_vm3, %v784_v5 }
 0x419   : > { %1088 = vmatprep.mubr.f32.mxu1 %v3731_v0 }
 0x41c   : > { %2138 = vmatmul.mubr.msk.f32.gmra.mrb[50].mxu1 %vm795_vm3, %v785_v6 }
 0x41d   : > { %1094 = vmatprep.mubr.f32.mxu1 %v3731_v0 }
 0x420   : > { %2139 = vmatmul.mubr.msk.f32.gmra.mrb[52].mxu1 %vm795_vm3, %v786_v7 }
 0x421   : > { %1100 = vmatprep.mubr.f32.mxu1 %v3731_v0 }
 0x424   : > { %2140 = vmatmul.mubr.msk.f32.gmra.mrb[54].mxu1 %vm795_vm3, %v787_v8 }
 0x425   : > { %1106 = vmatprep.mubr.f32.mxu1 %v3731_v0 }
 0x428   : > { %2141 = vmatmul.mubr.msk.f32.gmra.mrb[56].mxu1 %vm795_vm3, %v788_v9 }
 0x429   : > { %1112 = vmatprep.mubr.f32.mxu1 %v3731_v0 }
 0x42c   : > { %2142 = vmatmul.mubr.msk.f32.gmra.mrb[58].mxu1 %vm795_vm3, %v789_v10 }
 0x42d   : > { %1118 = vmatprep.mubr.f32.mxu1 %v3731_v0 }
 0x430   : > { %2143 = vmatmul.mubr.msk.f32.gmra.mrb[60].mxu1 %vm795_vm3, %v790_v11 }
 0x431   : > { %1124 = vmatprep.mubr.f32.mxu1 %v3731_v0 }
 0x434   : > { %2144 = vmatmul.mubr.msk.f32.gmra.mrb[62].mxu1 %vm795_vm3, %v791_v12 }
 0x435   : > { %1130 = vmatprep.mubr.f32.mxu1 %v3731_v0 }
 0x438   : > { %2145 = vmatmul.mubr.msk.f32.gmra.mrb[64].mxu1 %vm795_vm3, %v792_v13 }
 0x439   : > { %1136 = vmatprep.mubr.f32.mxu1 %v3731_v0 }
 0x43c   : > { %2146 = vmatmul.mubr.msk.f32.gmra.mrb[66].mxu1 %vm795_vm3, %v793_v14 }
 0x43d   : > { %1142 = vmatprep.mubr.f32.mxu1 %v3731_v0 }
 0x440   : > { %2147 = vmatmul.mubr.msk.f32.gmra.mrb[68].mxu1 %vm795_vm3, %v794_v15 }
 0x441   : > { %1966 = vmatprep.mubr.f32.mxu1 %v3731_v0 }
 0x497   : > { %v958_v19 = vpop.f32.mrb[6].mxu1 }
 0x498   : > { %v2942_v20 = vadd.f32 %v958_v19, %v2935_v17  ;;  %v960_v21 = vpop.f32.mrb[7].mxu1 }
 0x499   : > { %v2945_v22 = vadd.f32 %v960_v21, %v2939_v18 }
 0x49b   : > { %v964_v23 = vpop.f32.mrb[8].mxu1  ;;  %v1149_v24 = vmax.f32 %v2942_v20, %v2945_v22 }
 0x49c   : > { %v2950_v28 = vadd.f32 %v964_v23, %v2935_v17  ;;  %v966_v26 = vpop.f32.mrb[9].mxu1 }
 0x49d   : > { %v2953_v25 = vadd.f32 %v966_v26, %v2939_v18  ;;  %1150 = vmax.xlane.f32.xlu1 %v1149_v24 }
 0x49f   : > { %v970_v27 = vpop.f32.mrb[10].mxu1  ;;  %v1152_v31 = vmax.f32 %v2950_v28, %v2953_v25 }
 0x4a0   : > { %v2958_v32 = vadd.f32 %v970_v27, %v2935_v17  ;;  %v972_v33 = vpop.f32.mrb[11].mxu1 }
 0x4a1   : > { %v2961_v34 = vadd.f32 %v972_v33, %v2939_v18  ;;  %1153 = vmax.xlane.f32.xlu0 %v1152_v31 }
 0x4a3   : > { %v976_v35 = vpop.f32.mrb[12].mxu1  ;;  %v1155_v36 = vmax.f32 %v2958_v32, %v2961_v34 }
 0x4a4   : > { %v2966_v37 = vadd.f32 %v976_v35, %v2935_v17  ;;  %v978_v38 = vpop.f32.mrb[13].mxu1 }
 0x4a5   : > { %v2969_v40 = vadd.f32 %v978_v38, %v2939_v18  ;;  %1156 = vmax.xlane.f32.xlu1 %v1155_v36 }
 0x4a7   : > { %v982_v41 = vpop.f32.mrb[14].mxu1  ;;  %v1158_v45 = vmax.f32 %v2966_v37, %v2969_v40 }
 0x4a8   : > { %v2974_v46 = vadd.f32 %v982_v41, %v2935_v17  ;;  %v984_v48 = vpop.f32.mrb[15].mxu1 }
 0x4a9   : > { %v2977_v50 = vadd.f32 %v984_v48, %v2939_v18  ;;  %1159 = vmax.xlane.f32.xlu1 %v1158_v45 }
 0x4ab   : > { %v988_v51 = vpop.f32.mrb[16].mxu1  ;;  %v1161_v52 = vmax.f32 %v2974_v46, %v2977_v50 }
 0x4ac   : > { %v2982_v53 = vadd.f32 %v988_v51, %v2935_v17  ;;  %v990_v54 = vpop.f32.mrb[17].mxu1 }
 0x4ad   : > { %v2985_v55 = vadd.f32 %v990_v54, %v2939_v18  ;;  %1162 = vmax.xlane.f32.xlu1 %v1161_v52 }
 0x4af   : > { %v994_v56 = vpop.f32.mrb[18].mxu1  ;;  %v1164_v57 = vmax.f32 %v2982_v53, %v2985_v55 }
 0x4b0   : > { %v2990_v58 = vadd.f32 %v994_v56, %v2935_v17  ;;  %v996_v59 = vpop.f32.mrb[19].mxu1 }
 0x4b1   : > { %v2993_v60 = vadd.f32 %v996_v59, %v2939_v18  ;;  %1165 = vmax.xlane.f32.xlu1 %v1164_v57 }
 0x4b3   : > { %v1000_v61 = vpop.f32.mrb[20].mxu1  ;;  %v1167_v62 = vmax.f32 %v2990_v58, %v2993_v60 }
 0x4b4   : > { %v2998_v63 = vadd.f32 %v1000_v61, %v2935_v17  ;;  %v1002_v1 = vpop.f32.mrb[21].mxu1 }
 0x4b5   : > { %v3001_v2 = vadd.f32 %v1002_v1, %v2939_v18  ;;  %1168 = vmax.xlane.f32.xlu0 %v1167_v62 }
 0x4b7   : > { %v1006_v3 = vpop.f32.mrb[22].mxu1  ;;  %v1170_v4 = vmax.f32 %v2998_v63, %v3001_v2 }
 0x4b8   : > { %v3006_v5 = vadd.f32 %v1006_v3, %v2935_v17  ;;  %v1008_v6 = vpop.f32.mrb[23].mxu1 }
 0x4b9   : > { %v3009_v7 = vadd.f32 %v1008_v6, %v2939_v18  ;;  %1171 = vmax.xlane.f32.xlu1 %v1170_v4 }
 0x4bb   : > { %v1012_v8 = vpop.f32.mrb[24].mxu1  ;;  %v1173_v9 = vmax.f32 %v3006_v5, %v3009_v7 }
 0x4bc   : > { %v3014_v10 = vadd.f32 %v1012_v8, %v2935_v17  ;;  %v1014_v11 = vpop.f32.mrb[25].mxu1 }
 0x4bd   : > { %v3017_v12 = vadd.f32 %v1014_v11, %v2939_v18  ;;  %1174 = vmax.xlane.f32.xlu0 %v1173_v9 }
 0x4bf   : > { %v1018_v13 = vpop.f32.mrb[26].mxu1  ;;  %v1176_v14 = vmax.f32 %v3014_v10, %v3017_v12 }
 0x4c0   : > { %v3022_v15 = vadd.f32 %v1018_v13, %v2935_v17  ;;  %v1020_v16 = vpop.f32.mrb[27].mxu1 }
 0x4c1   : > { %v3025_v19 = vadd.f32 %v1020_v16, %v2939_v18  ;;  %1177 = vmax.xlane.f32.xlu1 %v1176_v14 }
 0x4c3   : > { %v1024_v21 = vpop.f32.mrb[28].mxu1  ;;  %v1179_v23 = vmax.f32 %v3022_v15, %v3025_v19 }
 0x4c4   : > { %v3030_v24 = vadd.f32 %v1024_v21, %v2935_v17  ;;  %v1026_v26 = vpop.f32.mrb[29].mxu1 }
 0x4c5   : > { %v3033_v27 = vadd.f32 %v1026_v26, %v2939_v18  ;;  %1180 = vmax.xlane.f32.xlu0 %v1179_v23 }
 0x4c7   : > { %v1030_v31 = vpop.f32.mrb[30].mxu1  ;;  %v1182_v33 = vmax.f32 %v3030_v24, %v3033_v27 }
 0x4c8   : > { %v3038_v35 = vadd.f32 %v1030_v31, %v2935_v17  ;;  %v1032_v36 = vpop.f32.mrb[31].mxu1 }
 0x4c9   : > { %v3041_v38 = vadd.f32 %v1032_v36, %v2939_v18  ;;  %1183 = vmax.xlane.f32.xlu1 %v1182_v33 }
 0x4cb   : > { %v1036_v41 = vpop.f32.mrb[32].mxu1  ;;  %v1185_v45 = vmax.f32 %v3038_v35, %v3041_v38 }
 0x4cc   : > { %v3046_v48 = vadd.f32 %v1036_v41, %v2935_v17  ;;  %v1038_v51 = vpop.f32.mrb[33].mxu1 }
 0x4cd   : > { %v3049_v52 = vadd.f32 %v1038_v51, %v2939_v18  ;;  %1186 = vmax.xlane.f32.xlu0 %v1185_v45 }
 0x4cf   : > { %v1042_v54 = vpop.f32.mrb[34].mxu1  ;;  %v1188_v56 = vmax.f32 %v3046_v48, %v3049_v52 }
 0x4d0   : > { %v3054_v57 = vadd.f32 %v1042_v54, %v2935_v17  ;;  %v1044_v59 = vpop.f32.mrb[35].mxu1 }
 0x4d1   : > { %v3057_v61 = vadd.f32 %v1044_v59, %v2939_v18  ;;  %1189 = vmax.xlane.f32.xlu1 %v1188_v56 }
 0x4d3   : > { %v1048_v62 = vpop.f32.mrb[36].mxu1  ;;  %v1191_v1 = vmax.f32 %v3054_v57, %v3057_v61 }
 0x4d4   : > { %v3062_v3 = vadd.f32 %v1048_v62, %v2935_v17  ;;  %v1050_v4 = vpop.f32.mrb[37].mxu1 }
 0x4d5   : > { %v3065_v6 = vadd.f32 %v1050_v4, %v2939_v18  ;;  %1192 = vmax.xlane.f32.xlu0 %v1191_v1 }
 0x4d7   : > { %v1054_v8 = vpop.f32.mrb[38].mxu1  ;;  %v1194_v9 = vmax.f32 %v3062_v3, %v3065_v6 }
 0x4d8   : > { %v3070_v11 = vadd.f32 %v1054_v8, %v2935_v17  ;;  %v1056_v13 = vpop.f32.mrb[39].mxu1 }
 0x4d9   : > { %v3073_v14 = vadd.f32 %v1056_v13, %v2939_v18  ;;  %1195 = vmax.xlane.f32.xlu1 %v1194_v9 }
 0x4db   : > { %3785 = vst [vmem:[#allocation20_spill] sm:$0xff] %v3073_v14  ;;  %v1060_v16 = vpop.f32.mrb[40].mxu1  ;;  %v1197_v21 = vmax.f32 %v3070_v11, %v3073_v14 }
 0x4dc   : > { %v3078_v23 = vadd.f32 %v1060_v16, %v2935_v17  ;;  %v1062_v26 = vpop.f32.mrb[41].mxu1 }
 0x4dd   : > { %v3081_v31 = vadd.f32 %v1062_v26, %v2939_v18  ;;  %1198 = vmax.xlane.f32.xlu0 %v1197_v21 }
 0x4de   : > { %3786 = vst [vmem:[#allocation21_spill] sm:$0xff] %v3078_v23 }
 0x4df   : > { %3787 = vst [vmem:[#allocation22_spill] sm:$0xff] %v3081_v31  ;;  %v1066_v33 = vpop.f32.mrb[42].mxu1  ;;  %v1200_v36 = vmax.f32 %v3078_v23, %v3081_v31 }
 0x4e0   : > { %v3086_v41 = vadd.f32 %v1066_v33, %v2935_v17  ;;  %v1068_v45 = vpop.f32.mrb[43].mxu1 }
 0x4e1   : > { %v3089_v51 = vadd.f32 %v1068_v45, %v2939_v18  ;;  %1201 = vmax.xlane.f32.xlu1 %v1200_v36 }
 0x4e2   : > { %3788 = vst [vmem:[#allocation23_spill] sm:$0xff] %v3086_v41 }
 0x4e3   : > { %3789 = vst [vmem:[#allocation24_spill] sm:$0xff] %v3089_v51  ;;  %v1072_v54 = vpop.f32.mrb[44].mxu1  ;;  %v1203_v56 = vmax.f32 %v3086_v41, %v3089_v51 }
 0x4e4   : > { %v3094_v59 = vadd.f32 %v1072_v54, %v2935_v17  ;;  %v1074_v62 = vpop.f32.mrb[45].mxu1 }
 0x4e5   : > { %v3097_v1 = vadd.f32 %v1074_v62, %v2939_v18  ;;  %1204 = vmax.xlane.f32.xlu0 %v1203_v56 }
 0x4e6   : > { %3790 = vst [vmem:[#allocation25_spill] sm:$0xff] %v3094_v59 }
 0x4e7   : > { %3791 = vst [vmem:[#allocation26_spill] sm:$0xff] %v3097_v1  ;;  %v1078_v4 = vpop.f32.mrb[46].mxu1  ;;  %v1206_v8 = vmax.f32 %v3094_v59, %v3097_v1 }
 0x4e8   : > { %v3102_v9 = vadd.f32 %v1078_v4, %v2935_v17  ;;  %v1080_v13 = vpop.f32.mrb[47].mxu1 }
 0x4e9   : > { %v3105_v16 = vadd.f32 %v1080_v13, %v2939_v18  ;;  %1207 = vmax.xlane.f32.xlu1 %v1206_v8 }
 0x4ea   : > { %3792 = vst [vmem:[#allocation27_spill] sm:$0xff] %v3102_v9 }
 0x4eb   : > { %3793 = vst [vmem:[#allocation28_spill] sm:$0xff] %v3105_v16  ;;  %v1084_v21 = vpop.f32.mrb[48].mxu1  ;;  %v1209_v26 = vmax.f32 %v3102_v9, %v3105_v16 }
 0x4ec   : > { %v3110_v33 = vadd.f32 %v1084_v21, %v2935_v17  ;;  %v1086_v36 = vpop.f32.mrb[49].mxu1 }
 0x4ed   : > { %v3113_v45 = vadd.f32 %v1086_v36, %v2939_v18  ;;  %1210 = vmax.xlane.f32.xlu0 %v1209_v26 }
 0x4ee   : > { %3794 = vst [vmem:[#allocation29_spill] sm:$0xff] %v3110_v33 }
 0x4ef   : > { %3795 = vst [vmem:[#allocation30_spill] sm:$0xff] %v3113_v45  ;;  %v1090_v54 = vpop.f32.mrb[50].mxu1  ;;  %v1212_v56 = vmax.f32 %v3110_v33, %v3113_v45 }
 0x4f0   : > { %v3118_v62 = vadd.f32 %v1090_v54, %v2935_v17  ;;  %v1092_v4 = vpop.f32.mrb[51].mxu1 }
 0x4f1   : > { %v3121_v8 = vadd.f32 %v1092_v4, %v2939_v18  ;;  %1213 = vmax.xlane.f32.xlu1 %v1212_v56 }
 0x4f2   : > { %3796 = vst [vmem:[#allocation31_spill] sm:$0xff] %v3118_v62 }
 0x4f3   : > { %3797 = vst [vmem:[#allocation32_spill] sm:$0xff] %v3121_v8  ;;  %v1096_v13 = vpop.f32.mrb[52].mxu1  ;;  %v1215_v21 = vmax.f32 %v3118_v62, %v3121_v8 }
 0x4f4   : > { %v3126_v36 = vadd.f32 %v1096_v13, %v2935_v17  ;;  %v1098_v26 = vpop.f32.mrb[53].mxu1 }
 0x4f5   : > { %v3129_v0 = vadd.f32 %v1098_v26, %v2939_v18  ;;  %1216 = vmax.xlane.f32.xlu0 %v1215_v21 }
 0x4f6   : > { %3798 = vst [vmem:[#allocation33_spill] sm:$0xff] %v3126_v36 }
 0x4f7   : > { %3799 = vst [vmem:[#allocation34_spill] sm:$0xff] %v3129_v0  ;;  %v1218_v54 = vmax.f32 %v3126_v36, %v3129_v0  ;;  %v1102_v47 = vpop.f32.mrb[54].mxu1 }
 0x4f8   : > { %v1104_v39 = vpop.f32.mrb[55].mxu1 }
 0x4f9   : > { %1219 = vmax.xlane.f32.xlu1 %v1218_v54 }
 0x4fb   : > { %v1108_v4 = vpop.f32.mrb[56].mxu1 }
 0x4fc   : > { %v1110_v56 = vpop.f32.mrb[57].mxu1 }
 0x4ff   : > { %v1114_v49 = vpop.f32.mrb[58].mxu1 }
 0x500   : > { %v1116_v43 = vpop.f32.mrb[59].mxu1 }
 0x503   : > { %v3133_v42 = vpop.f32.mrb[60].mxu1 }
 0x504   : > { %v3135_v44 = vpop.f32.mrb[61].mxu1 }
 0x507   : > { %v3137_v13 = vpop.f32.mrb[62].mxu1 }
 0x508   : > { %v3139_v29 = vpop.f32.mrb[63].mxu1 }
 0x50b   : > { %v3141_v26 = vpop.f32.mrb[64].mxu1 }
 0x50c   : > { %v3143_v21 = vpop.f32.mrb[65].mxu1 }
 0x50f   : > { %v3145_v30 = vpop.f32.mrb[66].mxu1 }
 0x510   : > { %v3147_v0 = vpop.f32.mrb[67].mxu1 }
 0x513   : > { %v3149_v54 = vpop.f32.mrb[68].mxu1 }
 0x514   : > { %v3151_v36 = vpop.f32.mrb[69].mxu1 }
 0x52a   : > { %v1151_v8 = vpop.xlane.xlu1 %1150 }
 0x52b   : > { %v1245_v62 = vsub.f32 %v2942_v20, %v1151_v8  ;;  %v1246_v45 = vsub.f32 %v2945_v22, %v1151_v8 }
 0x52d   : > { %v1309_v33 = vmul.f32 1.442695, %v1245_v62  ;;  %v1311_v16 = vmul.f32 1.442695, %v1246_v45 }
 0x52e   : > { %v1154_v9 = vpop.xlane.xlu0 %1153 }
 0x52f   : > { %2303 = vpow2.f32 %v1309_v33  ;;  %v1247_v1 = vsub.f32 %v2950_v28, %v1154_v9  ;;  %v1248_v59 = vsub.f32 %v2953_v25, %v1154_v9  ;;  %v3162_v25 = vadd.f32 %v1102_v47, %v2935_v17 }
 0x530   : > { %2305 = vpow2.f32 %v1311_v16  ;;  %v3180_v9 = vadd.f32 %v1108_v4, %v2935_v17  ;;  %v3183_v16 = vadd.f32 %v1110_v56, %v2939_v18  ;;  %v3195_v4 = vadd.f32 %v1116_v43, %v2939_v18 }
 0x531   : > { %v1313_v51 = vmul.f32 1.442695, %v1247_v1  ;;  %v1315_v41 = vmul.f32 1.442695, %v1248_v59  ;;  %v3165_v59 = vadd.f32 %v1104_v39, %v2939_v18 }
 0x532   : > { %v1157_v31 = vpop.xlane.xlu1 %1156 }
 0x533   : > { %2307 = vpow2.f32 %v1313_v51  ;;  %v1249_v23 = vsub.f32 %v2958_v32, %v1157_v31  ;;  %v1250_v14 = vsub.f32 %v2961_v34, %v1157_v31  ;;  %v1221_v39 = vmax.f32 %v3162_v25, %v3165_v59 }
 0x534   : > { %2309 = vpow2.f32 %v1315_v41 }
 0x535   : > { %v1317_v20 = vmul.f32 1.442695, %v1249_v23  ;;  %v1319_v22 = vmul.f32 1.442695, %v1250_v14 }
 0x536   : > { %v1160_v62 = vpop.xlane.xlu1 %1159 }
 0x537   : > { %2311 = vpow2.f32 %v1317_v20  ;;  %v1251_v33 = vsub.f32 %v2966_v37, %v1160_v62  ;;  %v1252_v28 = vsub.f32 %v2969_v40, %v1160_v62 }
 0x538   : > { %2313 = vpow2.f32 %v1319_v22  ;;  %v3192_v22 = vadd.f32 %v1114_v49, %v2935_v17 }
 0x539   : > { %v3167_v51 = vpop.eup %2303  ;;  %v1321_v32 = vmul.f32 1.442695, %v1251_v33  ;;  %v1323_v34 = vmul.f32 1.442695, %v1252_v28 }
 0x53a   : > { %v3169_v31 = vpop.eup %2305  ;;  %v1163_v14 = vpop.xlane.xlu1 %1162 }
 0x53b   : > { %2315 = vpow2.f32 %v1321_v32  ;;  %v1253_v23 = vsub.f32 %v2974_v46, %v1163_v14  ;;  %v1254_v37 = vsub.f32 %v2977_v50, %v1163_v14  ;;  %v1437_v40 = vadd.f32 %v3169_v31, %v3167_v51 }
 0x53c   : > { %2317 = vpow2.f32 %v1323_v34  ;;  %v1227_v34 = vmax.f32 %v3192_v22, %v3195_v4 }
 0x53d   : > { %v3177_v47 = vpop.eup %2307  ;;  %v1325_v41 = vmul.f32 1.442695, %v1253_v23  ;;  %v1327_v1 = vmul.f32 1.442695, %v1254_v37  ;;  %1438 = vadd.xlane.f32.xlu0 %v1437_v40  ;;  %v3213_v40 = vadd.f32 %v3133_v42, %v2935_v17  ;;  %v3227_v42 = vadd.f32 %v3137_v13, %v2935_v17 }
 0x53e   : > { %v3185_v46 = vpop.eup %2309  ;;  %v1166_v50 = vpop.xlane.xlu1 %1165 }
 0x53f   : > { %2319 = vpow2.f32 %v1325_v41  ;;  %v1255_v45 = vsub.f32 %v2982_v53, %v1166_v50  ;;  %v1256_v8 = vsub.f32 %v2985_v55, %v1166_v50  ;;  %v1440_v20 = vadd.f32 %v3185_v46, %v3177_v47 }
 0x540   : > { %2321 = vpow2.f32 %v1327_v1  ;;  %v1224_v53 = vmax.f32 %v3180_v9, %v3183_v16 }
 0x541   : > { %v3197_v56 = vpop.eup %2311  ;;  %v1329_v62 = vmul.f32 1.442695, %v1255_v45  ;;  %v1331_v33 = vmul.f32 1.442695, %v1256_v8  ;;  %1441 = vadd.xlane.f32.xlu1 %v1440_v20  ;;  %1222 = vmax.xlane.f32.xlu0 %v1221_v39 }
 0x542   : > { %v3201_v55 = vpop.eup %2313  ;;  %v1169_v28 = vpop.xlane.xlu0 %1168 }
 0x543   : > { %2323 = vpow2.f32 %v1329_v62  ;;  %v1257_v32 = vsub.f32 %v2990_v58, %v1169_v28  ;;  %v1258_v49 = vsub.f32 %v2993_v60, %v1169_v28  ;;  %v1443_v43 = vadd.f32 %v3201_v55, %v3197_v56 }
 0x544   : > { %2325 = vpow2.f32 %v1331_v33  ;;  %v3217_v58 = vadd.f32 %v3135_v44, %v2939_v18  ;;  %v3231_v44 = vadd.f32 %v3139_v29, %v2939_v18 }
 0x545   : > { %v3209_v14 = vpop.eup %2315  ;;  %v1333_v23 = vmul.f32 1.442695, %v1257_v32  ;;  %v1335_v37 = vmul.f32 1.442695, %v1258_v49  ;;  %1225 = vmax.xlane.f32.xlu1 %v1224_v53  ;;  %1444 = vadd.xlane.f32.xlu0 %v1443_v43  ;;  %v3249_v43 = vadd.f32 %v3141_v26, %v2935_v17  ;;  %v3263_v26 = vadd.f32 %v3145_v30, %v2935_v17 }
 0x546   : > { %v3219_v60 = vpop.eup %2317  ;;  %v1172_v39 = vpop.xlane.xlu1 %1171  ;;  %v1233_v53 = vmax.f32 %v3227_v42, %v3231_v44 }
 0x547   : > { %2327 = vpow2.f32 %v1333_v23  ;;  %v1259_v41 = vsub.f32 %v2998_v63, %v1172_v39  ;;  %v1260_v1 = vsub.f32 %v3001_v2, %v1172_v39  ;;  %v1446_v50 = vadd.f32 %v3219_v60, %v3209_v14 }
 0x548   : > { %2329 = vpow2.f32 %v1335_v37  ;;  %v1230_v63 = vmax.f32 %v3213_v40, %v3217_v58 }
 0x549   : > { %v3233_v45 = vpop.eup %2319  ;;  %v1337_v8 = vmul.f32 1.442695, %v1259_v41  ;;  %v1339_v20 = vmul.f32 1.442695, %v1260_v1  ;;  %1228 = vmax.xlane.f32.xlu0 %v1227_v34  ;;  %1447 = vadd.xlane.f32.xlu1 %v1446_v50 }
 0x54a   : > { %v3237_v2 = vpop.eup %2321  ;;  %v1175_v62 = vpop.xlane.xlu0 %1174 }
 0x54b   : > { %2331 = vpow2.f32 %v1337_v8  ;;  %v1261_v13 = vsub.f32 %v3006_v5, %v1175_v62  ;;  %v1262_v33 = vsub.f32 %v3009_v7, %v1175_v62  ;;  %v1449_v29 = vadd.f32 %v3237_v2, %v3233_v45 }
 0x54c   : > { %2333 = vpow2.f32 %v1339_v20  ;;  %v3253_v5 = vadd.f32 %v3143_v21, %v2939_v18  ;;  %v3267_v21 = vadd.f32 %v3147_v0, %v2939_v18 }
 0x54d   : > { %v3245_v28 = vpop.eup %2323  ;;  %v1341_v32 = vmul.f32 1.442695, %v1261_v13  ;;  %v1343_v49 = vmul.f32 1.442695, %v1262_v33  ;;  %1231 = vmax.xlane.f32.xlu1 %v1230_v63  ;;  %1450 = vadd.xlane.f32.xlu0 %v1449_v29  ;;  %v3285_v29 = vadd.f32 %v3149_v54, %v2935_v17 }
 0x54e   : > { %v3255_v7 = vpop.eup %2325  ;;  %v1178_v34 = vpop.xlane.xlu1 %1177  ;;  %v1239_v63 = vmax.f32 %v3263_v26, %v3267_v21 }
 0x54f   : > { %2335 = vpow2.f32 %v1341_v32  ;;  %v1263_v23 = vsub.f32 %v3014_v10, %v1178_v34  ;;  %v1264_v37 = vsub.f32 %v3017_v12, %v1178_v34  ;;  %v1452_v39 = vadd.f32 %v3255_v7, %v3245_v28 }
 0x550   : > { %2337 = vpow2.f32 %v1343_v49  ;;  %v1236_v10 = vmax.f32 %v3249_v43, %v3253_v5 }
 0x551   : > { %v3269_v41 = vpop.eup %2327  ;;  %v1345_v1 = vmul.f32 1.442695, %v1263_v23  ;;  %v1347_v50 = vmul.f32 1.442695, %v1264_v37  ;;  %1234 = vmax.xlane.f32.xlu0 %v1233_v53  ;;  %1453 = vadd.xlane.f32.xlu1 %v1452_v39 }
 0x552   : > { %v3273_v12 = vpop.eup %2329  ;;  %v1181_v8 = vpop.xlane.xlu0 %1180 }
 0x553   : > { %2339 = vpow2.f32 %v1345_v1  ;;  %v1265_v30 = vsub.f32 %v3022_v15, %v1181_v8  ;;  %v1266_v20 = vsub.f32 %v3025_v19, %v1181_v8  ;;  %v1455_v0 = vadd.f32 %v3273_v12, %v3269_v41 }
 0x554   : > { %2341 = vpow2.f32 %v1347_v50  ;;  %v3289_v15 = vadd.f32 %v3151_v36, %v2939_v18 }
 0x555   : > { %v3281_v62 = vpop.eup %2331  ;;  %v1349_v13 = vmul.f32 1.442695, %v1265_v30  ;;  %v1351_v33 = vmul.f32 1.442695, %v1266_v20  ;;  %1456 = vadd.xlane.f32.xlu0 %v1455_v0  ;;  %1237 = vmax.xlane.f32.xlu1 %v1236_v10 }
 0x556   : > { %v3291_v19 = vpop.eup %2333  ;;  %v1184_v53 = vpop.xlane.xlu1 %1183  ;;  %v1242_v18 = vmax.f32 %v3285_v29, %v3289_v15 }
 0x557   : > { %2343 = vpow2.f32 %v1349_v13  ;;  %v1267_v32 = vsub.f32 %v3030_v24, %v1184_v53  ;;  %v1268_v49 = vsub.f32 %v3033_v27, %v1184_v53  ;;  %v1458_v34 = vadd.f32 %v3291_v19, %v3281_v62 }
 0x558   : > { %2345 = vpow2.f32 %v1351_v33 }
 0x559   : > { %v3297_v23 = vpop.eup %2335  ;;  %v1353_v17 = vmul.f32 1.442695, %v1267_v32  ;;  %v1355_v54 = vmul.f32 1.442695, %v1268_v49  ;;  %1240 = vmax.xlane.f32.xlu0 %v1239_v63  ;;  %1459 = vadd.xlane.f32.xlu1 %v1458_v34 }
 0x55a   : > { %v3301_v36 = vpop.eup %2337  ;;  %v1187_v37 = vpop.xlane.xlu0 %1186 }
 0x55b   : > { %2347 = vpow2.f32 %v1353_v17  ;;  %v1269_v24 = vsub.f32 %v3038_v35, %v1187_v37  ;;  %v1270_v27 = vsub.f32 %v3041_v38, %v1187_v37  ;;  %v1461_v39 = vadd.f32 %v3301_v36, %v3297_v23 }
 0x55c   : > { %2349 = vpow2.f32 %v1355_v54 }
 0x55d   : > { %v3307_v1 = vpop.eup %2339  ;;  %v1357_v50 = vmul.f32 1.442695, %v1269_v24  ;;  %v1359_v10 = vmul.f32 1.442695, %v1270_v27  ;;  %1462 = vadd.xlane.f32.xlu0 %v1461_v39  ;;  %1243 = vmax.xlane.f32.xlu1 %v1242_v18 }
 0x55e   : > { %v3309_v8 = vpop.eup %2341  ;;  %v1190_v30 = vpop.xlane.xlu1 %1189 }
 0x55f   : > { %2351 = vpow2.f32 %v1357_v50  ;;  %v1271_v20 = vsub.f32 %v3046_v48, %v1190_v30  ;;  %v1272_v35 = vsub.f32 %v3049_v52, %v1190_v30  ;;  %v1464_v38 = vadd.f32 %v3309_v8, %v3307_v1 }
 0x560   : > { %2353 = vpow2.f32 %v1359_v10 }
 0x561   : > { %v3315_v0 = vpop.eup %2343  ;;  %v1361_v63 = vmul.f32 1.442695, %v1271_v20  ;;  %v1363_v13 = vmul.f32 1.442695, %v1272_v35  ;;  %1465 = vadd.xlane.f32.xlu1 %v1464_v38  ;;  %v3800_v20 = vld [vmem:[#allocation20_spill] sm:$0xff] }
 0x562   : > { %v3317_v33 = vpop.eup %2345  ;;  %v1193_v53 = vpop.xlane.xlu0 %1192 }
 0x563   : > { %2355 = vpow2.f32 %v1361_v63  ;;  %v1273_v32 = vsub.f32 %v3054_v57, %v1193_v53  ;;  %v1274_v49 = vsub.f32 %v3057_v61, %v1193_v53  ;;  %v1467_v48 = vadd.f32 %v3317_v33, %v3315_v0 }
 0x564   : > { %2357 = vpow2.f32 %v1363_v13 }
 0x565   : > { %v3323_v52 = vpop.eup %2347  ;;  %v1365_v34 = vmul.f32 1.442695, %v1273_v32  ;;  %v1367_v17 = vmul.f32 1.442695, %v1274_v49  ;;  %1468 = vadd.xlane.f32.xlu0 %v1467_v48  ;;  %v3801_v32 = vld [vmem:[#allocation21_spill] sm:$0xff]  ;;  %v3802_v48 = vld [vmem:[#allocation22_spill] sm:$0xff] }
 0x566   : > { %v3325_v54 = vpop.eup %2349  ;;  %v1196_v18 = vpop.xlane.xlu1 %1195 }
 0x567   : > { %2359 = vpow2.f32 %v1365_v34  ;;  %v1275_v37 = vsub.f32 %v3062_v3, %v1196_v18  ;;  %v1276_v24 = vsub.f32 %v3065_v6, %v1196_v18  ;;  %v1470_v57 = vadd.f32 %v3325_v54, %v3323_v52 }
 0x568   : > { %2361 = vpow2.f32 %v1367_v17 }
 0x569   : > { %v3331_v61 = vpop.eup %2351  ;;  %v1369_v27 = vmul.f32 1.442695, %v1275_v37  ;;  %v1371_v39 = vmul.f32 1.442695, %v1276_v24  ;;  %1471 = vadd.xlane.f32.xlu1 %v1470_v57 }
 0x56a   : > { %v3333_v50 = vpop.eup %2353  ;;  %v1199_v10 = vpop.xlane.xlu0 %1198 }
 0x56b   : > { %2363 = vpow2.f32 %v1369_v27  ;;  %v1277_v30 = vsub.f32 %v3070_v11, %v1199_v10  ;;  %v1278_v35 = vsub.f32 %v3800_v20, %v1199_v10  ;;  %v1473_v3 = vadd.f32 %v3333_v50, %v3331_v61  ;;  %v3803_v27 = vld [vmem:[#allocation23_spill] sm:$0xff]  ;;  %v3804_v10 = vld [vmem:[#allocation24_spill] sm:$0xff] }
 0x56c   : > { %2365 = vpow2.f32 %v1371_v39 }
 0x56d   : > { %v3339_v6 = vpop.eup %2355  ;;  %v1373_v38 = vmul.f32 1.442695, %v1277_v30  ;;  %v1375_v63 = vmul.f32 1.442695, %v1278_v35  ;;  %1474 = vadd.xlane.f32.xlu0 %v1473_v3 }
 0x56e   : > { %v3341_v13 = vpop.eup %2357  ;;  %v1202_v53 = vpop.xlane.xlu1 %1201 }
 0x56f   : > { %2367 = vpow2.f32 %v1373_v38  ;;  %v1279_v49 = vsub.f32 %v3801_v32, %v1202_v53  ;;  %v1280_v34 = vsub.f32 %v3802_v48, %v1202_v53  ;;  %v1476_v11 = vadd.f32 %v3341_v13, %v3339_v6  ;;  %v3807_v32 = vld [vmem:[#allocation25_spill] sm:$0xff]  ;;  %v3808_v48 = vld [vmem:[#allocation26_spill] sm:$0xff] }
 0x570   : > { %2369 = vpow2.f32 %v1375_v63 }
 0x571   : > { %v3347_v17 = vpop.eup %2359  ;;  %v1377_v18 = vmul.f32 1.442695, %v1279_v49  ;;  %v1379_v37 = vmul.f32 1.442695, %v1280_v34  ;;  %1477 = vadd.xlane.f32.xlu1 %v1476_v11 }
 0x572   : > { %v3349_v24 = vpop.eup %2361  ;;  %v1205_v57 = vpop.xlane.xlu0 %1204 }
 0x573   : > { %2371 = vpow2.f32 %v1377_v18  ;;  %v1281_v39 = vsub.f32 %v3803_v27, %v1205_v57  ;;  %v1282_v30 = vsub.f32 %v3804_v10, %v1205_v57  ;;  %v1479_v20 = vadd.f32 %v3349_v24, %v3347_v17  ;;  %v3811_v10 = vld [vmem:[#allocation27_spill] sm:$0xff] }
 0x574   : > { %2373 = vpow2.f32 %v1379_v37 }
 0x575   : > { %v3355_v35 = vpop.eup %2363  ;;  %v1381_v3 = vmul.f32 1.442695, %v1281_v39  ;;  %v1383_v38 = vmul.f32 1.442695, %v1282_v30  ;;  %1480 = vadd.xlane.f32.xlu0 %v1479_v20  ;;  %v3812_v20 = vld [vmem:[#allocation28_spill] sm:$0xff] }
 0x576   : > { %3805 = vst [vmem:[#allocation20_spill] sm:$0xff] %v3355_v35  ;;  %v3357_v63 = vpop.eup %2365  ;;  %v1208_v53 = vpop.xlane.xlu1 %1207 }
 0x577   : > { %3806 = vst [vmem:[#allocation21_spill] sm:$0xff] %v3357_v63  ;;  %2375 = vpow2.f32 %v1381_v3  ;;  %v1283_v49 = vsub.f32 %v3807_v32, %v1208_v53  ;;  %v1284_v34 = vsub.f32 %v3808_v48, %v1208_v53  ;;  %v1482_v11 = vadd.f32 %v3357_v63, %v3355_v35 }
 0x578   : > { %2377 = vpow2.f32 %v1383_v38 }
 0x579   : > { %v3363_v18 = vpop.eup %2367  ;;  %v1385_v37 = vmul.f32 1.442695, %v1283_v49  ;;  %v1387_v57 = vmul.f32 1.442695, %v1284_v34  ;;  %1483 = vadd.xlane.f32.xlu1 %v1482_v11  ;;  %v3815_v11 = vld [vmem:[#allocation29_spill] sm:$0xff] }
 0x57a   : > { %3809 = vst [vmem:[#allocation22_spill] sm:$0xff] %v3363_v18  ;;  %v3365_v27 = vpop.eup %2369  ;;  %v1211_v39 = vpop.xlane.xlu0 %1210 }
 0x57b   : > { %3810 = vst [vmem:[#allocation23_spill] sm:$0xff] %v3365_v27  ;;  %2379 = vpow2.f32 %v1385_v37  ;;  %v1285_v30 = vsub.f32 %v3811_v10, %v1211_v39  ;;  %v1286_v3 = vsub.f32 %v3812_v20, %v1211_v39  ;;  %v1485_v53 = vadd.f32 %v3365_v27, %v3363_v18  ;;  %v3816_v37 = vld [vmem:[#allocation30_spill] sm:$0xff] }
 0x57c   : > { %2381 = vpow2.f32 %v1387_v57 }
 0x57d   : > { %v3371_v32 = vpop.eup %2371  ;;  %v1389_v38 = vmul.f32 1.442695, %v1285_v30  ;;  %v1391_v48 = vmul.f32 1.442695, %v1286_v3  ;;  %1486 = vadd.xlane.f32.xlu0 %v1485_v53  ;;  %v3817_v53 = vld [vmem:[#allocation31_spill] sm:$0xff] }
 0x57e   : > { %3813 = vst [vmem:[#allocation24_spill] sm:$0xff] %v3371_v32  ;;  %v3373_v49 = vpop.eup %2373  ;;  %v1214_v34 = vpop.xlane.xlu1 %1213 }
 0x57f   : > { %3814 = vst [vmem:[#allocation25_spill] sm:$0xff] %v3373_v49  ;;  %2383 = vpow2.f32 %v1389_v38  ;;  %v1287_v35 = vsub.f32 %v3815_v11, %v1214_v34  ;;  %v1288_v63 = vsub.f32 %v3816_v37, %v1214_v34  ;;  %v1488_v39 = vadd.f32 %v3373_v49, %v3371_v32  ;;  %v3818_v38 = vld [vmem:[#allocation32_spill] sm:$0xff] }
 0x580   : > { %2385 = vpow2.f32 %v1391_v48 }
 0x581   : > { %v3379_v10 = vpop.eup %2375  ;;  %v1393_v57 = vmul.f32 1.442695, %v1287_v35  ;;  %v1395_v20 = vmul.f32 1.442695, %v1288_v63  ;;  %1489 = vadd.xlane.f32.xlu1 %v1488_v39  ;;  %v3820_v39 = vld [vmem:[#allocation33_spill] sm:$0xff] }
 0x582   : > { %v3381_v30 = vpop.eup %2377  ;;  %v1217_v3 = vpop.xlane.xlu0 %1216 }
 0x583   : > { %2387 = vpow2.f32 %v1393_v57  ;;  %v1289_v18 = vsub.f32 %v3817_v53, %v1217_v3  ;;  %v1290_v27 = vsub.f32 %v3818_v38, %v1217_v3  ;;  %v1491_v34 = vadd.f32 %v3381_v30, %v3379_v10  ;;  %v3821_v57 = vld [vmem:[#allocation34_spill] sm:$0xff] }
 0x584   : > { %2389 = vpow2.f32 %v1395_v20 }
 0x585   : > { %v3387_v11 = vpop.eup %2379  ;;  %v1397_v48 = vmul.f32 1.442695, %v1289_v18  ;;  %v1399_v37 = vmul.f32 1.442695, %v1290_v27  ;;  %1492 = vadd.xlane.f32.xlu0 %v1491_v34 }
 0x586   : > { %3819 = vst [vmem:[#allocation26_spill] sm:$0xff] %v3387_v11  ;;  %v3389_v35 = vpop.eup %2381  ;;  %v1220_v63 = vpop.xlane.xlu1 %1219 }
 0x587   : > { %2391 = vpow2.f32 %v1397_v48  ;;  %v1291_v32 = vsub.f32 %v3820_v39, %v1220_v63  ;;  %v1292_v49 = vsub.f32 %v3821_v57, %v1220_v63  ;;  %v1494_v3 = vadd.f32 %v3389_v35, %v3387_v11 }
 0x588   : > { %2393 = vpow2.f32 %v1399_v37 }
 0x589   : > { %v3395_v53 = vpop.eup %2383  ;;  %v1401_v20 = vmul.f32 1.442695, %v1291_v32  ;;  %v1403_v38 = vmul.f32 1.442695, %v1292_v49  ;;  %1495 = vadd.xlane.f32.xlu1 %v1494_v3 }
 0x58a   : > { %3822 = vst [vmem:[#allocation27_spill] sm:$0xff] %v3395_v53  ;;  %v3397_v18 = vpop.eup %2385 }
 0x58b   : > { %3823 = vst [vmem:[#allocation28_spill] sm:$0xff] %v3397_v18  ;;  %2395 = vpow2.f32 %v1401_v20  ;;  %v1497_v27 = vadd.f32 %v3397_v18, %v3395_v53 }
 0x58c   : > { %2397 = vpow2.f32 %v1403_v38 }
 0x58d   : > { %v3401_v34 = vpop.eup %2387  ;;  %1498 = vadd.xlane.f32.xlu0 %v1497_v27 }
 0x58e   : > { %3824 = vst [vmem:[#allocation29_spill] sm:$0xff] %v3401_v34  ;;  %v3403_v48 = vpop.eup %2389 }
 0x58f   : > { %3825 = vst [vmem:[#allocation30_spill] sm:$0xff] %v3403_v48  ;;  %v1500_v37 = vadd.f32 %v3403_v48, %v3401_v34 }
 0x591   : > { %v3407_v63 = vpop.eup %2391  ;;  %1501 = vadd.xlane.f32.xlu1 %v1500_v37 }
 0x592   : > { %3826 = vst [vmem:[#allocation31_spill] sm:$0xff] %v3407_v63  ;;  %v3409_v32 = vpop.eup %2393 }
 0x593   : > { %3827 = vst [vmem:[#allocation32_spill] sm:$0xff] %v3409_v32  ;;  %v1503_v49 = vadd.f32 %v3409_v32, %v3407_v63 }
 0x595   : > { %v3413_v39 = vpop.eup %2395  ;;  %1504 = vadd.xlane.f32.xlu0 %v1503_v49 }
 0x596   : > { %3828 = vst [vmem:[#allocation33_spill] sm:$0xff] %v3413_v39  ;;  %v3415_v57 = vpop.eup %2397 }
 0x597   : > { %3829 = vst [vmem:[#allocation34_spill] sm:$0xff] %v3415_v57  ;;  %v1506_v3 = vadd.f32 %v3415_v57, %v3413_v39 }
 0x599   : > { %1507 = vadd.xlane.f32.xlu1 %v1506_v3 }
 0x5ca   : > { %v1439_v20 = vpop.xlane.xlu0 %1438 }
 0x5cb   : > { %2399 = vrcp.f32 %v1439_v20 }
 0x5ce   : > { %v1223_v38 = vpop.xlane.xlu0 %1222  ;;  %v1442_v27 = vpop.xlane.xlu1 %1441 }
 0x5cf   : > { %v1293_v37 = vsub.f32 %v3162_v25, %v1223_v38  ;;  %v1294_v34 = vsub.f32 %v3165_v59, %v1223_v38  ;;  %2401 = vrcp.f32 %v1442_v27 }
 0x5d1   : > { %v1405_v48 = vmul.f32 1.442695, %v1293_v37  ;;  %v1407_v63 = vmul.f32 1.442695, %v1294_v34 }
 0x5d2   : > { %v1445_v32 = vpop.xlane.xlu0 %1444  ;;  %v1226_v53 = vpop.xlane.xlu1 %1225 }
 0x5d3   : > { %2403 = vpow2.f32 %v1405_v48  ;;  %v1295_v49 = vsub.f32 %v3180_v9, %v1226_v53  ;;  %v1296_v18 = vsub.f32 %v3183_v16, %v1226_v53 }
 0x5d4   : > { %2405 = vpow2.f32 %v1407_v63 }
 0x5d5   : > { %v2400_v3 = vpop.eup %2399  ;;  %2407 = vrcp.f32 %v1445_v32  ;;  %v1409_v20 = vmul.f32 1.442695, %v1295_v49  ;;  %v1411_v39 = vmul.f32 1.442695, %v1296_v18 }
 0x5d6   : > { %v1229_v57 = vpop.xlane.xlu0 %1228  ;;  %v1448_v11 = vpop.xlane.xlu1 %1447  ;;  %v1566_v34 = vmul.f32 %v2400_v3, %v3169_v31  ;;  %v1565_v48 = vmul.f32 %v2400_v3, %v3167_v51 }
 0x5d7   : > { %2409 = vpow2.f32 %v1409_v20  ;;  %v1297_v25 = vsub.f32 %v3192_v22, %v1229_v57  ;;  %v1298_v59 = vsub.f32 %v3195_v4, %v1229_v57  ;;  %v3830_v57 = vld [vmem:[#allocation13_spill] sm:$0xff] }
 0x5d8   : > { %2411 = vpow2.f32 %v1411_v39  ;;  %v1641_v31 = vmul.f32 %v3830_v57, %v1566_v34  ;;  %v3831_v39 = vld [vmem:[#allocation12_spill] sm:$0xff] }
 0x5d9   : > { %v2402_v9 = vpop.eup %2401  ;;  %v1413_v38 = vmul.f32 1.442695, %v1297_v25  ;;  %v1415_v16 = vmul.f32 1.442695, %v1298_v59  ;;  %2413 = vrcp.f32 %v1448_v11  ;;  %v1640_v27 = vmul.f32 %v3831_v39, %v1565_v48 }
 0x5da   : > { %v1451_v53 = vpop.xlane.xlu0 %1450  ;;  %v1232_v63 = vpop.xlane.xlu1 %1231  ;;  %v1568_v18 = vmul.f32 %v2402_v9, %v3185_v46  ;;  %v1567_v32 = vmul.f32 %v2402_v9, %v3177_v47 }
 0x5db   : > { %2415 = vpow2.f32 %v1413_v38  ;;  %v1299_v22 = vsub.f32 %v3213_v40, %v1232_v63  ;;  %v1300_v4 = vsub.f32 %v3217_v58, %v1232_v63 }
 0x5dc   : > { %2417 = vpow2.f32 %v1415_v16  ;;  %v1643_v51 = vmul.f32 %v3830_v57, %v1568_v18  ;;  %v1642_v11 = vmul.f32 %v3831_v39, %v1567_v32 }
 0x5dd   : > { %v3435_v37 = vpop.eup %2403  ;;  %2419 = vrcp.f32 %v1451_v53  ;;  %v1417_v46 = vmul.f32 1.442695, %v1299_v22  ;;  %v1419_v49 = vmul.f32 1.442695, %v1300_v4 }
 0x5de   : > { %v3437_v47 = vpop.eup %2405  ;;  %v1235_v3 = vpop.xlane.xlu0 %1234  ;;  %v2174_v20 = vpack.c.bf16 %v1643_v51, %v1641_v31  ;;  %v2176_v58 = vpack.c.bf16 %v1642_v11, %v1640_v27 }
 0x5df   : > { %v1454_v40 = vpop.xlane.xlu1 %1453  ;;  %v2408_v25 = vpop.eup %2407  ;;  %2421 = vpow2.f32 %v1417_v46  ;;  %v1301_v59 = vsub.f32 %v3227_v42, %v1235_v3  ;;  %v1302_v34 = vsub.f32 %v3231_v44, %v1235_v3  ;;  %v1509_v48 = vadd.f32 %v3437_v47, %v3435_v37 }
 0x5e0   : > { %2423 = vpow2.f32 %v1419_v49  ;;  %2175 = vmatprep.subr.bf16.mxu0 %v2174_v20  ;;  %v1570_v42 = vmul.f32 %v2408_v25, %v3201_v55  ;;  %v1569_v44 = vmul.f32 %v2408_v25, %v3197_v56 }
 0x5e1   : > { %v3443_v9 = vpop.eup %2409  ;;  %v1421_v38 = vmul.f32 1.442695, %v1301_v59  ;;  %v1423_v16 = vmul.f32 1.442695, %v1302_v34  ;;  %2425 = vrcp.f32 %v1454_v40  ;;  %1510 = vadd.xlane.f32.xlu0 %v1509_v48  ;;  %2177 = vmatpush1.bf16.xpose.msra.mxu0 %v2176_v58 }
 0x5e2   : > { %v3445_v53 = vpop.eup %2411  ;;  %v1457_v63 = vpop.xlane.xlu0 %1456  ;;  %v1644_v40 = vmul.f32 %v3831_v39, %v1569_v44 }
 0x5e3   : > { %v1238_v18 = vpop.xlane.xlu1 %1237  ;;  %v2414_v32 = vpop.eup %2413  ;;  %2427 = vpow2.f32 %v1421_v38  ;;  %v1512_v31 = vadd.f32 %v3445_v53, %v3443_v9 }
 0x5e4   : > { %v1303_v22 = vsub.f32 %v3249_v43, %v1238_v18  ;;  %v1304_v4 = vsub.f32 %v3253_v5, %v1238_v18  ;;  %2429 = vpow2.f32 %v1423_v16  ;;  %v1572_v51 = vmul.f32 %v2414_v32, %v3219_v60 }
 0x5e5   : > { %v1571_v27 = vmul.f32 %v2414_v32, %v3209_v14  ;;  %v3455_v11 = vpop.eup %2415  ;;  %2431 = vrcp.f32 %v1457_v63  ;;  %1513 = vadd.xlane.f32.xlu1 %v1512_v31  ;;  %v1645_v5 = vmul.f32 %v3830_v57, %v1570_v42 }
 0x5e6   : > { %v1425_v55 = vmul.f32 1.442695, %v1303_v22  ;;  %v1427_v46 = vmul.f32 1.442695, %v1304_v4  ;;  %v3457_v56 = vpop.eup %2417  ;;  %v1241_v49 = vpop.xlane.xlu0 %1240  ;;  %v1647_v3 = vmul.f32 %v3830_v57, %v1572_v51 }
 0x5e7   : > { %v1460_v43 = vpop.xlane.xlu1 %1459  ;;  %v1646_v60 = vmul.f32 %v3831_v39, %v1571_v27  ;;  %v2420_v20 = vpop.eup %2419  ;;  %v1305_v14 = vsub.f32 %v3263_v26, %v1241_v49  ;;  %v1306_v58 = vsub.f32 %v3267_v21, %v1241_v49  ;;  %v1515_v25 = vadd.f32 %v3457_v56, %v3455_v11 }
 0x5e8   : > { %2433 = vpow2.f32 %v1425_v55  ;;  %v2178_v59 = vpack.c.bf16 %v1647_v3, %v1645_v5  ;;  %v1574_v26 = vmul.f32 %v2420_v20, %v3237_v2  ;;  %v1573_v21 = vmul.f32 %v2420_v20, %v3233_v45 }
 0x5e9   : > { %2435 = vpow2.f32 %v1427_v46  ;;  %v2180_v34 = vpack.c.bf16 %v1646_v60, %v1644_v40  ;;  %v3467_v48 = vpop.eup %2421  ;;  %v1429_v38 = vmul.f32 1.442695, %v1305_v14  ;;  %v1431_v16 = vmul.f32 1.442695, %v1306_v58  ;;  %1516 = vadd.xlane.f32.xlu0 %v1515_v25 }
 0x5ea   : > { %2437 = vrcp.f32 %v1460_v43  ;;  %v3469_v63 = vpop.eup %2423  ;;  %2179 = vmatprep.subr.bf16.mxu0 %v2178_v59  ;;  %v1463_v18 = vpop.xlane.xlu0 %1462  ;;  %v1648_v49 = vmul.f32 %v3831_v39, %v1573_v21 }
 0x5eb   : > { %v1244_v42 = vpop.xlane.xlu1 %1243  ;;  %v2426_v44 = vpop.eup %2425  ;;  %2439 = vpow2.f32 %v1429_v38  ;;  %2181 = vmatpush1.bf16.xpose.msra.mxu0 %v2180_v34  ;;  %v1518_v4 = vadd.f32 %v3469_v63, %v3467_v48 }
 0x5ec   : > { %v1307_v32 = vsub.f32 %v3285_v29, %v1244_v42  ;;  %v1308_v22 = vsub.f32 %v3289_v15, %v1244_v42  ;;  %2441 = vpow2.f32 %v1431_v16  ;;  %v1576_v31 = vmul.f32 %v2426_v44, %v3255_v7 }
 0x5ed   : > { %v1575_v51 = vmul.f32 %v2426_v44, %v3245_v28  ;;  %v3479_v27 = vpop.eup %2427  ;;  %2443 = vrcp.f32 %v1463_v18  ;;  %1519 = vadd.xlane.f32.xlu1 %v1518_v4  ;;  %v1649_v29 = vmul.f32 %v3830_v57, %v1574_v26 }
 0x5ee   : > { %v1433_v2 = vmul.f32 1.442695, %v1307_v32  ;;  %v1435_v45 = vmul.f32 1.442695, %v1308_v22  ;;  %v3481_v55 = vpop.eup %2429  ;;  %v1651_v15 = vmul.f32 %v3830_v57, %v1576_v31 }
 0x5ef   : > { %v1466_v46 = vpop.xlane.xlu1 %1465  ;;  %v1650_v43 = vmul.f32 %v3831_v39, %v1575_v51  ;;  %v2432_v7 = vpop.eup %2431  ;;  %v1521_v28 = vadd.f32 %v3481_v55, %v3479_v27 }
 0x5f0   : > { %2445 = vpow2.f32 %v1433_v2  ;;  %v2182_v5 = vpack.c.bf16 %v1651_v15, %v1649_v29  ;;  %v1578_v14 = vmul.f32 %v2432_v7, %v3273_v12  ;;  %v1577_v58 = vmul.f32 %v2432_v7, %v3269_v41 }
 0x5f1   : > { %2447 = vpow2.f32 %v1435_v45  ;;  %v2184_v3 = vpack.c.bf16 %v1650_v43, %v1648_v49  ;;  %1522 = vadd.xlane.f32.xlu0 %v1521_v28 }
 0x5f2   : > { %v3489_v40 = vpop.eup %2433  ;;  %2449 = vrcp.f32 %v1466_v46  ;;  %2183 = vmatprep.subr.bf16.mxu0 %v2182_v5  ;;  %v1469_v20 = vpop.xlane.xlu0 %1468  ;;  %v1653_v12 = vmul.f32 %v3830_v57, %v1578_v14  ;;  %v1652_v26 = vmul.f32 %v3831_v39, %v1577_v58 }
 0x5f3   : > { %v3491_v60 = vpop.eup %2435  ;;  %2185 = vmatpush1.bf16.xpose.msra.mxu0 %v2184_v3  ;;  %2451 = vrcp.f32 %v1469_v20 }
 0x5f4   : > { %v2438_v25 = vpop.eup %2437  ;;  %v1524_v59 = vadd.f32 %v3491_v60, %v3489_v40 }
 0x5f5   : > { %v1580_v34 = vmul.f32 %v2438_v25, %v3291_v19  ;;  %v1579_v38 = vmul.f32 %v2438_v25, %v3281_v62  ;;  %v3499_v16 = vpop.eup %2439 }
 0x5f6   : > { %1525 = vadd.xlane.f32.xlu1 %v1524_v59  ;;  %v3501_v18 = vpop.eup %2441  ;;  %v1472_v42 = vpop.xlane.xlu1 %1471 }
 0x5f7   : > { %v1655_v41 = vmul.f32 %v3830_v57, %v1580_v34  ;;  %v1654_v21 = vmul.f32 %v3831_v39, %v1579_v38  ;;  %v2444_v44 = vpop.eup %2443  ;;  %2453 = vrcp.f32 %v1472_v42  ;;  %v1527_v19 = vadd.f32 %v3501_v18, %v3499_v16 }
 0x5f8   : > { %v1582_v51 = vmul.f32 %v2444_v44, %v3301_v36  ;;  %v1581_v2 = vmul.f32 %v2444_v44, %v3297_v23 }
 0x5f9   : > { %v2186_v62 = vpack.c.bf16 %v1655_v41, %v1653_v12  ;;  %v2188_v32 = vpack.c.bf16 %v1654_v21, %v1652_v26  ;;  %1528 = vadd.xlane.f32.xlu0 %v1527_v19 }
 0x5fa   : > { %v3509_v22 = vpop.eup %2445  ;;  %v1475_v31 = vpop.xlane.xlu0 %1474  ;;  %v1657_v7 = vmul.f32 %v3830_v57, %v1582_v51  ;;  %v1656_v36 = vmul.f32 %v3831_v39, %v1581_v2 }
 0x5fb   : > { %v3511_v4 = vpop.eup %2447  ;;  %2187 = vmatprep.subr.bf16.mxu0 %v2186_v62  ;;  %2455 = vrcp.f32 %v1475_v31  ;;  %v1779_v62 = vld [vmem:[%s3722_s8] sm:$0xff] }
 0x5fc   : > { %v2450_v45 = vpop.eup %2449  ;;  %2189 = vmatpush1.bf16.xpose.msra.mxu0 %v2188_v32  ;;  %v1530_v46 = vadd.f32 %v3511_v4, %v3509_v22  ;;  %v609_v32 = vld [vmem:[%s3720_s6 + $0x10] sm:$0xff] }
 0x5fd   : > { %v1584_v29 = vmul.f32 %v2450_v45, %v3309_v8  ;;  %v1583_v15 = vmul.f32 %v2450_v45, %v3307_v1  ;;  %v2452_v49 = vpop.eup %2451  ;;  %v1780_v45 = vld [vmem:[%s3722_s8 + $0x8] sm:$0xff] }
 0x5fe   : > { %1531 = vadd.xlane.f32.xlu1 %v1530_v46  ;;  %v1478_v43 = vpop.xlane.xlu1 %1477  ;;  %v1586_v20 = vmul.f32 %v2452_v49, %v3317_v33  ;;  %v1585_v8 = vmul.f32 %v2452_v49, %v3315_v0 }
 0x5ff   : > { %v1659_v28 = vmul.f32 %v3830_v57, %v1584_v29  ;;  %v1658_v23 = vmul.f32 %v3831_v39, %v1583_v15  ;;  %2457 = vrcp.f32 %v1478_v43  ;;  %v1885_v29 = vld [vmem:[%s3724_s10 + $0x8] sm:$0xff] }
 0x600   : > { %v1661_v59 = vmul.f32 %v3830_v57, %v1586_v20  ;;  %v1660_v33 = vmul.f32 %v3831_v39, %v1585_v8 }
 0x601   : > { %v2190_v5 = vpack.c.bf16 %v1659_v28, %v1657_v7  ;;  %v2192_v3 = vpack.c.bf16 %v1658_v23, %v1656_v36  ;;  %v2454_v14 = vpop.eup %2453  ;;  %v3832_v28 = vld [vmem:[#allocation21_spill] sm:$0xff]  ;;  %v3833_v23 = vld [vmem:[#allocation20_spill] sm:$0xff] }
 0x602   : > { %v1481_v1 = vpop.xlane.xlu0 %1480  ;;  %v1588_v58 = vmul.f32 %v2454_v14, %v3325_v54  ;;  %v1587_v25 = vmul.f32 %v2454_v14, %v3323_v52 }
 0x603   : > { %2191 = vmatprep.subr.bf16.mxu0 %v2190_v5  ;;  %2459 = vrcp.f32 %v1481_v1 }
 0x604   : > { %2193 = vmatpush1.bf16.xpose.msra.mxu0 %v2192_v3  ;;  %v1663_v34 = vmul.f32 %v3830_v57, %v1588_v58  ;;  %v1662_v38 = vmul.f32 %v3831_v39, %v1587_v25  ;;  %v1884_v3 = vld [vmem:[%s3724_s10] sm:$0xff] }
 0x605   : > { %v2456_v42 = vpop.eup %2455 }
 0x606   : > { %v1484_v12 = vpop.xlane.xlu1 %1483  ;;  %v2194_v41 = vpack.c.bf16 %v1663_v34, %v1661_v59  ;;  %v2196_v0 = vpack.c.bf16 %v1662_v38, %v1660_v33  ;;  %v1590_v54 = vmul.f32 %v2456_v42, %v3333_v50  ;;  %v1589_v52 = vmul.f32 %v2456_v42, %v3331_v61  ;;  %v3834_v59 = vld [vmem:[#allocation23_spill] sm:$0xff]  ;;  %v3835_v42 = vld [vmem:[#allocation22_spill] sm:$0xff] }
 0x607   : > { %2461 = vrcp.f32 %v1484_v12 }
 0x608   : > { %2195 = vmatprep.subr.bf16.mxu0 %v2194_v41  ;;  %v1665_v50 = vmul.f32 %v3830_v57, %v1590_v54  ;;  %v3836_v41 = vld [vmem:[#allocation25_spill] sm:$0xff]  ;;  %v3837_v54 = vld [vmem:[#allocation24_spill] sm:$0xff] }
 0x609   : > { %v2458_v26 = vpop.eup %2457 }
 0x60a   : > { %v1487_v21 = vpop.xlane.xlu0 %1486  ;;  %v1592_v44 = vmul.f32 %v2458_v26, %v3341_v13  ;;  %v1591_v19 = vmul.f32 %v2458_v26, %v3339_v6  ;;  %v1664_v13 = vmul.f32 %v3831_v39, %v1589_v52 }
 0x60b   : > { %2463 = vrcp.f32 %v1487_v21 }
 0x60c   : > { %2197 = vmatpush1.bf16.xpose.msra.mxu0 %v2196_v0  ;;  %v1667_v31 = vmul.f32 %v3830_v57, %v1592_v44  ;;  %v1666_v61 = vmul.f32 %v3831_v39, %v1591_v19 }
 0x60d   : > { %v2460_v51 = vpop.eup %2459 }
 0x60e   : > { %v1490_v6 = vpop.xlane.xlu1 %1489  ;;  %v2198_v2 = vpack.c.bf16 %v1667_v31, %v1665_v50  ;;  %v2200_v46 = vpack.c.bf16 %v1666_v61, %v1664_v13  ;;  %v1594_v15 = vmul.f32 %v2460_v51, %v3349_v24  ;;  %v1593_v43 = vmul.f32 %v2460_v51, %v3347_v17 }
 0x60f   : > { %1783 = vperm.xlu1 %2298, %v1779_v62   ;;  %622 = vperm.xlu0 %2297, %v609_v32   ;;  %2465 = vrcp.f32 %v1490_v6 }
 0x610   : > { %2199 = vmatprep.subr.bf16.mxu0 %v2198_v2  ;;  %v1669_v20 = vmul.f32 %v3830_v57, %v1594_v15  ;;  %v1668_v8 = vmul.f32 %v3831_v39, %v1593_v43 }
 0x611   : > { %v2462_v49 = vpop.eup %2461 }
 0x612   : > { %v1493_v7 = vpop.xlane.xlu0 %1492  ;;  %v1596_v36 = vmul.f32 %v2462_v49, %v3832_v28  ;;  %v1595_v5 = vmul.f32 %v2462_v49, %v3833_v23 }
 0x613   : > { %1788 = vperm.xlu1 %2298, %v1780_v45   ;;  %1893 = vperm.xlu0 %2297, %v1885_v29   ;;  %2467 = vrcp.f32 %v1493_v7  ;;  %v3838_v45 = vld [vmem:[#allocation26_spill] sm:$0xff] }
 0x614   : > { %2201 = vmatpush1.bf16.xpose.msra.mxu0 %v2200_v46  ;;  %v1671_v24 = vmul.f32 %v3830_v57, %v1596_v36  ;;  %v1670_v14 = vmul.f32 %v3831_v39, %v1595_v5  ;;  %v3839_v36 = vld [vmem:[#allocation28_spill] sm:$0xff]  ;;  %v3840_v5 = vld [vmem:[#allocation27_spill] sm:$0xff] }
 0x615   : > { %v2464_v17 = vpop.eup %2463 }
 0x616   : > { %v1496_v1 = vpop.xlane.xlu1 %1495  ;;  %v2202_v58 = vpack.c.bf16 %v1671_v24, %v1669_v20  ;;  %v2204_v25 = vpack.c.bf16 %v1670_v14, %v1668_v8  ;;  %v1598_v34 = vmul.f32 %v2464_v17, %v3834_v59  ;;  %v1597_v33 = vmul.f32 %v2464_v17, %v3835_v42  ;;  %v3841_v20 = vld [vmem:[#allocation30_spill] sm:$0xff]  ;;  %v3842_v14 = vld [vmem:[#allocation29_spill] sm:$0xff]  ;;  %v3843_v42 = vld [vmem:[#allocation32_spill] sm:$0xff] }
 0x617   : > { %1888 = vperm.xlu1 %2298, %v1884_v3   ;;  %2469 = vrcp.f32 %v1496_v1 }
 0x618   : > { %2203 = vmatprep.subr.bf16.mxu0 %v2202_v58  ;;  %v1673_v52 = vmul.f32 %v3830_v57, %v1598_v34  ;;  %v1672_v62 = vmul.f32 %v3831_v39, %v1597_v33 }
 0x619   : > { %v2466_v38 = vpop.eup %2465 }
 0x61a   : > { %v1499_v12 = vpop.xlane.xlu0 %1498  ;;  %v1600_v0 = vmul.f32 %v2466_v38, %v3836_v41  ;;  %v1599_v26 = vmul.f32 %v2466_v38, %v3837_v54  ;;  %v3844_v41 = vld [vmem:[#allocation31_spill] sm:$0xff]  ;;  %v3845_v54 = vld [vmem:[#allocation34_spill] sm:$0xff] }
 0x61b   : > { %2471 = vrcp.f32 %v1499_v12 }
 0x61c   : > { %2205 = vmatpush1.bf16.xpose.msra.mxu0 %v2204_v25  ;;  %v1675_v21 = vmul.f32 %v3830_v57, %v1600_v0  ;;  %v1674_v44 = vmul.f32 %v3831_v39, %v1599_v26 }
 0x61d   : > { %v2468_v19 = vpop.eup %2467 }
 0x61e   : > { %v1502_v32 = vpop.xlane.xlu1 %1501  ;;  %v2206_v50 = vpack.c.bf16 %v1675_v21, %v1673_v52  ;;  %v2208_v31 = vpack.c.bf16 %v1674_v44, %v1672_v62  ;;  %v1602_v61 = vmul.f32 %v2468_v19, %v3381_v30  ;;  %v1601_v13 = vmul.f32 %v2468_v19, %v3379_v10  ;;  %v3846_v52 = vld [vmem:[#allocation33_spill] sm:$0xff] }
 0x61f   : > { %2473 = vrcp.f32 %v1502_v32 }
 0x620   : > { %2207 = vmatprep.subr.bf16.mxu0 %v2206_v50  ;;  %v1677_v29 = vmul.f32 %v3830_v57, %v1602_v61  ;;  %v1676_v7 = vmul.f32 %v3831_v39, %v1601_v13 }
 0x621   : > { %v2470_v51 = vpop.eup %2469 }
 0x622   : > { %v1505_v6 = vpop.xlane.xlu0 %1504  ;;  %v1604_v2 = vmul.f32 %v2470_v51, %v3389_v35  ;;  %v1603_v46 = vmul.f32 %v2470_v51, %v3838_v45 }
 0x623   : > { %2475 = vrcp.f32 %v1505_v6 }
 0x624   : > { %2209 = vmatpush1.bf16.xpose.msra.mxu0 %v2208_v31  ;;  %v1679_v15 = vmul.f32 %v3830_v57, %v1604_v2  ;;  %v1678_v49 = vmul.f32 %v3831_v39, %v1603_v46 }
 0x625   : > { %v2472_v43 = vpop.eup %2471 }
 0x626   : > { %v1508_v30 = vpop.xlane.xlu1 %1507  ;;  %v2210_v28 = vpack.c.bf16 %v1679_v15, %v1677_v29  ;;  %v2212_v10 = vpack.c.bf16 %v1678_v49, %v1676_v7  ;;  %v1606_v35 = vmul.f32 %v2472_v43, %v3839_v36  ;;  %v1605_v3 = vmul.f32 %v2472_v43, %v3840_v5 }
 0x627   : > { %2477 = vrcp.f32 %v1508_v30 }
 0x628   : > { %2211 = vmatprep.subr.bf16.mxu0 %v2210_v28  ;;  %v1681_v8 = vmul.f32 %v3830_v57, %v1606_v35  ;;  %v1680_v59 = vmul.f32 %v3831_v39, %v1605_v3 }
 0x629   : > { %v2474_v23 = vpop.eup %2473 }
 0x62a   : > { %v1608_v24 = vmul.f32 %v2474_v23, %v3841_v20  ;;  %v1607_v17 = vmul.f32 %v2474_v23, %v3842_v14 }
 0x62c   : > { %2213 = vmatpush1.bf16.xpose.msra.mxu0 %v2212_v10  ;;  %v1683_v1 = vmul.f32 %v3830_v57, %v1608_v24  ;;  %v1682_v58 = vmul.f32 %v3831_v39, %v1607_v17 }
 0x62d   : > { %v2476_v25 = vpop.eup %2475 }
 0x62e   : > { %v2214_v34 = vpack.c.bf16 %v1683_v1, %v1681_v8  ;;  %v2216_v38 = vpack.c.bf16 %v1682_v58, %v1680_v59  ;;  %v1610_v33 = vmul.f32 %v2476_v25, %v3843_v42  ;;  %v1609_v0 = vmul.f32 %v2476_v25, %v3844_v41  ;;  %v3847_v42 = vld [vmem:[#allocation19_spill] sm:$0xff] }
 0x630   : > { %2215 = vmatprep.subr.bf16.mxu0 %v2214_v34  ;;  %v1685_v44 = vmul.f32 %v3830_v57, %v1610_v33  ;;  %v1684_v32 = vmul.f32 %v3831_v39, %v1609_v0 }
 0x631   : > { %v2478_v12 = vpop.eup %2477 }
 0x632   : > { %v1612_v26 = vmul.f32 %v2478_v12, %v3845_v54  ;;  %v1611_v21 = vmul.f32 %v2478_v12, %v3846_v52 }
 0x634   : > { %2217 = vmatpush1.bf16.xpose.msra.mxu0 %v2216_v38  ;;  %v1687_v19 = vmul.f32 %v3830_v57, %v1612_v26  ;;  %v1686_v62 = vmul.f32 %v3831_v39, %v1611_v21 }
 0x636   : > { %v2218_v50 = vpack.c.bf16 %v1687_v19, %v1685_v44  ;;  %v2220_v31 = vpack.c.bf16 %v1686_v62, %v1684_v32 }
 0x638   : > { %2219 = vmatprep.subr.bf16.mxu0 %v2218_v50 }
 0x63c   : > { %2221 = vmatpush1.bf16.xpose.msra.mxu0 %v2220_v31 }
 0x66e   : > { %v1511_v61 = vpop.xlane.xlu0 %1510 }
 0x66f   : > { %2479 = vrcp.f32 %v1511_v61 }
 0x672   : > { %v1514_v51 = vpop.xlane.xlu1 %1513 }
 0x673   : > { %2481 = vrcp.f32 %v1514_v51  ;;  %v3849_v51 = vmov 0.0  }
 0x676   : > { %v1517_v13 = vpop.xlane.xlu0 %1516 }
 0x677   : > { %2483 = vrcp.f32 %v1517_v13 }
 0x679   : > { %v2480_v6 = vpop.eup %2479 }
 0x67a   : > { %v1520_v2 = vpop.xlane.xlu1 %1519  ;;  %v1614_v45 = vmul.f32 %v2480_v6, %v3437_v47  ;;  %v1613_v46 = vmul.f32 %v2480_v6, %v3435_v37 }
 0x67b   : > { %2485 = vrcp.f32 %v1520_v2  ;;  %v1777_v2 = vld [vmem:[%s3721_s7] sm:$0xff] }
 0x67c   : > { %v1689_v7 = vmul.f32 %v3830_v57, %v1614_v45  ;;  %v1688_v28 = vmul.f32 %v3831_v39, %v1613_v46  ;;  %v1778_v45 = vld [vmem:[%s3721_s7 + $0x8] sm:$0xff] }
 0x67d   : > { %v2482_v29 = vpop.eup %2481 }
 0x67e   : > { %v1523_v15 = vpop.xlane.xlu0 %1522  ;;  %v1616_v49 = vmul.f32 %v2482_v29, %v3445_v53  ;;  %v1615_v43 = vmul.f32 %v2482_v29, %v3443_v9 }
 0x67f   : > { %2487 = vrcp.f32 %v1523_v15 }
 0x680   : > { %v1691_v30 = vmul.f32 %v3830_v57, %v1616_v49  ;;  %v1690_v10 = vmul.f32 %v3831_v39, %v1615_v43 }
 0x681   : > { %v2484_v36 = vpop.eup %2483 }
 0x682   : > { %v2222_v47 = vpack.c.bf16 %v1691_v30, %v1689_v7  ;;  %v2224_v23 = vpack.c.bf16 %v1690_v10, %v1688_v28  ;;  %v1618_v37 = vmul.f32 %v2484_v36, %v3457_v56  ;;  %v1617_v53 = vmul.f32 %v2484_v36, %v3455_v11 }
 0x683   : > { %v1526_v35 = vpop.xlane.xlu1 %1525 }
 0x684   : > { %2489 = vrcp.f32 %v1526_v35  ;;  %2223 = vmatprep.subr.bf16.mxu0 %v2222_v47  ;;  %v1693_v24 = vmul.f32 %v3830_v57, %v1618_v37  ;;  %v1692_v17 = vmul.f32 %v3831_v39, %v1617_v53  ;;  %v3850_v53 = vld [vmem:[#allocation15_spill] sm:$0xff] }
 0x685   : > { %v2486_v9 = vpop.eup %2485  ;;  %2225 = vmatpush1.bf16.xpose.msra.mxu0 %v2224_v23 }
 0x686   : > { %v1529_v5 = vpop.xlane.xlu0 %1528  ;;  %v1620_v3 = vmul.f32 %v2486_v9, %v3469_v63  ;;  %v1619_v20 = vmul.f32 %v2486_v9, %v3467_v48 }
 0x687   : > { %2491 = vrcp.f32 %v1529_v5  ;;  %v3851_v5 = vld [vmem:[#allocation17_spill] sm:$0xff] }
 0x688   : > { %v1695_v14 = vmul.f32 %v3830_v57, %v1620_v3  ;;  %v1694_v8 = vmul.f32 %v3831_v39, %v1619_v20  ;;  %v3852_v20 = vld [vmem:[#allocation14_spill] sm:$0xff] }
 0x689   : > { %v2488_v1 = vpop.eup %2487 }
 0x68a   : > { %v2226_v58 = vpack.c.bf16 %v1695_v14, %v1693_v24  ;;  %v2228_v11 = vpack.c.bf16 %v1694_v8, %v1692_v17  ;;  %v1622_v25 = vmul.f32 %v2488_v1, %v3481_v55  ;;  %v1621_v63 = vmul.f32 %v2488_v1, %v3479_v27  ;;  %v3853_v14 = vld [vmem:[#allocation16_spill] sm:$0xff] }
 0x68b   : > { %v1532_v56 = vpop.xlane.xlu1 %1531 }
 0x68c   : > { %2493 = vrcp.f32 %v1532_v56  ;;  %2227 = vmatprep.subr.bf16.mxu0 %v2226_v58  ;;  %v1697_v12 = vmul.f32 %v3830_v57, %v1622_v25  ;;  %v1696_v0 = vmul.f32 %v3831_v39, %v1621_v63  ;;  %v1882_v56 = vld [vmem:[%s3723_s9] sm:$0xff]  ;;  %v1883_v58 = vld [vmem:[%s3723_s9 + $0x8] sm:$0xff] }
 0x68d   : > { %2229 = vmatpush1.bf16.xpose.msra.mxu0 %v2228_v11 }
 0x68e   : > { %v2490_v48 = vpop.eup %2489  ;;  %v623_v59 = vpop.permute.xlu0 %622 }
 0x68f   : > { %v1624_v34 = vmul.f32 %v2490_v48, %v3491_v60  ;;  %v1623_v38 = vmul.f32 %v2490_v48, %v3489_v40  ;;  %v716_v33 = vadd.f32 %v3847_v42, %v623_v59  ;;  %v1784_v46 = vpop.permute.xlu1 %1783 }
 0x691   : > { %v1699_v41 = vmul.f32 %v3830_v57, %v1624_v34  ;;  %v1698_v54 = vmul.f32 %v3831_v39, %v1623_v38  ;;  %v2492_v55 = vpop.eup %2491  ;;  %1768 = vmatprep.mubr.f32.mxu0 %v716_v33  ;;  %v2495_v34 = vld [vmem:[%s2767_s30 + $0x20] sm:$0xff]  ;;  %v2496_v33 = vld [vmem:[%s2767_s30 + $0x28] sm:$0xff] }
 0x692   : > { %v1626_v52 = vmul.f32 %v2492_v55, %v3501_v18  ;;  %v1625_v60 = vmul.f32 %v2492_v55, %v3499_v16  ;;  %v3848_v18 = vld [vmem:[#allocation18_spill] sm:$0xff]  ;;  %v1894_v42 = vpop.permute.xlu0 %1893 }
 0x693   : > { %v2230_v27 = vpack.c.bf16 %v1699_v41, %v1697_v12  ;;  %v2232_v26 = vpack.c.bf16 %v1698_v54, %v1696_v0  ;;  %v714_v16 = vadd.f32 %v3848_v18, %v623_v59  ;;  %v1789_v7 = vpop.permute.xlu1 %1788 }
 0x694   : > { %v1701_v19 = vmul.f32 %v3830_v57, %v1626_v52  ;;  %v1700_v32 = vmul.f32 %v3831_v39, %v1625_v60  ;;  %v2497_v52 = vld [vmem:[%s2767_s30 + $0x30] sm:$0xff] }
 0x695   : > { %2231 = vmatprep.subr.bf16.mxu0 %v2230_v27 }
 0x696   : > { %v2494_v40 = vpop.eup %2493  ;;  %2233 = vmatpush1.bf16.xpose.msra.mxu0 %v2232_v26 }
 0x697   : > { %v1628_v21 = vmul.f32 %v2494_v40, %v3511_v4  ;;  %v1627_v44 = vmul.f32 %v2494_v40, %v3509_v22  ;;  %v1889_v11 = vpop.permute.xlu1 %1888  ;;  %v2498_v40 = vld [vmem:[%s2767_s30 + $0x38] sm:$0xff]  ;;  %s2602_s30 = smov [#allocation5]  }
 0x698   : > { %s2533_s25 = sshll.u32 %s2602_s30, 4  ;;  %s2534_s25 = int_to_ptr.vmem [resolvable:$false] %s2533_s25 }
 0x699   : > { %v1703_v62 = vmul.f32 %v3830_v57, %v1628_v21  ;;  %v1702_v50 = vmul.f32 %v3831_v39, %v1627_v44  ;;  %s2535_s13 = scalar_lea.vmem %s2534_s25, 1024  ;;  %p2536_p10 = scmp.lt.s32.totalorder %s3662_s26, %s2534_s25 }
 0x69a   : > { %p2537_p0 = scmp.lt.s32.totalorder %s2535_s13, %s2529_s29 }
 0x69b   : > { %v2234_v31 = vpack.c.bf16 %v1703_v62, %v1701_v19  ;;  %v2236_v61 = vpack.c.bf16 %v1702_v50, %v1700_v32 }
 0x69c   : > { %p2538_p2 = por %p2537_p0, %p2536_p10 }
 0x69d   : > { %2235 = vmatprep.subr.bf16.mxu0 %v2234_v31 }
 0x69e   : > { %2237 = vmatpush1.bf16.xpose.msra.mxu0 %v2236_v61  ;;  %p2539_p4 = pnand %p2538_p2, %p2532_p8 }
 0x6a5   : > { %1769 = vmatmul.mubr.f32.vlgmr.msra.gmra.mrb[4].mxu0 %v714_v16 }
 0x6a6   : > { %1861 = vmatprep.mubr.f32.mxu0 %v3849_v51 }
 0x778   : > { %v1770_v4 = vpop.f32.mrb[4].mxu0 }
 0x779   : > { %v1772_v13 = vpop.f32.mrb[5].mxu0  ;;  %v1775_v6 = vmax.f32 %v1770_v4, 0.0 }
 0x77a   : > { %v1776_v22 = vmax.f32 %v1772_v13, 0.0 }
 0x77c   : > { %1797 = vmatprep.subr.mxu0 %v1776_v22 }
 0x77d   : > { %1798 = vmatpush1.msra.mxu0 %v1775_v6 }
 0x77e   : > { %2148 = vmatmul.mubr.msk.f32.vlgmr.msra.gmra.mrb[6].mxu0 %vm795_vm3, %v1777_v2 }
 0x77f   : > { %1867 = vmatprep.mubr.f32.mxu0 %v3849_v51 }
 0x782   : > { %2149 = vmatmul.mubr.msk.f32.gmra.mrb[8].mxu0 %vm795_vm3, %v1778_v45 }
 0x851   : > { %v1863_v29 = vpop.f32.mrb[6].mxu0 }
 0x852   : > { %v1864_v15 = vadd.f32 %v1863_v29, %v1784_v46  ;;  %v1865_v49 = vpop.f32.mrb[7].mxu0 }
 0x853   : > { %v1866_v43 = vadd.f32 %v1865_v49, %v1784_v46 }
 0x854   : > { %v1874_v28 = vmul.f32 %v1864_v15, %v3831_v39 }
 0x855   : > { %v1869_v30 = vpop.f32.mrb[8].mxu0  ;;  %v1875_v35 = vmul.f32 %v1866_v43, %v3830_v57 }
 0x856   : > { %v1870_v10 = vadd.f32 %v1869_v30, %v1789_v7  ;;  %v1871_v36 = vpop.f32.mrb[9].mxu0  ;;  %v1878_v9 = vadd.f32 %v1874_v28, %v3850_v53 }
 0x857   : > { %v1872_v47 = vadd.f32 %v1871_v36, %v1789_v7  ;;  %v1879_v24 = vadd.f32 %v1875_v35, %v3852_v20 }
 0x858   : > { %v1876_v23 = vmul.f32 %v1870_v10, %v3831_v39 }
 0x859   : > { %v1877_v37 = vmul.f32 %v1872_v47, %v3830_v57 }
 0x85a   : > { %v1880_v3 = vadd.f32 %v1876_v23, %v3851_v5 }
 0x85b   : > { %v1881_v17 = vadd.f32 %v1877_v37, %v3853_v14 }
 0x85c   : > { %v2240_v8 = vpack.c.bf16 %v1880_v3, %v1878_v9 }
 0x85d   : > { %v2238_v1 = vpack.c.bf16 %v1881_v17, %v1879_v24 }
 0x85f   : > { %2239 = vmatprep.subr.bf16.mxu1 %v2238_v1 }
 0x860   : > { %2241 = vmatpush1.bf16.msra.mxu1 %v2240_v8 }
 0x863   : > { %2150 = vmatmul.mubr.msk.f32.vlgmr.msra.gmra.mrb[70].mxu1 %vm625_vm2, %v1882_v56 }
 0x864   : > { %1972 = vmatprep.mubr.f32.mxu1 %v3849_v51 }
 0x867   : > { %2151 = vmatmul.mubr.msk.f32.gmra.mrb[72].mxu1 %vm625_vm2, %v1883_v58 }
 0x936   : > { %v1968_v25 = vpop.f32.mrb[70].mxu1 }
 0x937   : > { %v1969_v63 = vadd.f32 %v1968_v25, %v1889_v11  ;;  %v1970_v48 = vpop.f32.mrb[71].mxu1 }
 0x938   : > { %v1971_v59 = vadd.f32 %v1970_v48, %v1889_v11 }
 0x939   : > { %v1979_v38 = vadd.f32 %v2495_v34, %v1969_v63 }
 0x93a   : > { %v1980_v12 = vadd.f32 %v2496_v33, %v1971_v59  ;;  %v1974_v41 = vpop.f32.mrb[72].mxu1 }
 0x93b   : > { %v1983_v0 = vmul.f32 %v1979_v38, %v3831_v39  ;;  %v1975_v54 = vadd.f32 %v1974_v41, %v1894_v42  ;;  %v1976_v55 = vpop.f32.mrb[73].mxu1 }
 0x93c   : > { %v1984_v27 = vmul.f32 %v1980_v12, %v3830_v57  ;;  %v1977_v26 = vadd.f32 %v1976_v55, %v1894_v42 }
 0x93d   : > { %1987 = vst [vmem:[%s430_s15] sm:$0xff] %v1983_v0  ;;  %v1981_v60 = vadd.f32 %v2497_v52, %v1975_v54 }
 0x93e   : > { %1988 = vst [vmem:[%s430_s15 + $0x8] sm:$0xff] %v1984_v27  ;;  %v1982_v21 = vadd.f32 %v2498_v40, %v1977_v26 }
 0x93f   : > { %v1985_v44 = vmul.f32 %v1981_v60, %v3831_v39 }
 0x940   : > { %v1986_v19 = vmul.f32 %v1982_v21, %v3830_v57 }
 0x941   : > { %1989 = vst [vmem:[%s430_s15 + $0x10] sm:$0xff] %v1985_v44 }
 0x942   : > { %1990 = vst [vmem:[%s430_s15 + $0x18] sm:$0xff] %v1986_v19 }
 0x943   : > { %2542 = shalt.err (!%p2539_p4)
}
 0x944   : > { %s2543_s24 = scalar_lea.hbm %s3669_s19, 512  ;;  %s2547_s15 = scalar_lea.hbm %s3725_s11, 1024 }
 0x945   : > { %p2544_p5 = scmp.ne.s32.totalorder %s3669_s19, %s2543_s24  ;;  %p2548_p1 = scmp.lt.u32.totalorder %s3669_s19, %s3725_s11 }
 0x946   : > { %p2549_p3 = scmp.lt.u32.totalorder %s2547_s15, %s2543_s24  ;;  %p2551_p11 = scmp.lt.u32.totalorder %s2543_s24, %s3669_s19 }
 0x947   : > { %p2545_p7 = pnand %p2544_p5, %p3854_p12 }
 0x948   : > { %p2550_p6 = por %p2549_p3, %p2548_p1 }
 0x949   : > { %p2546_p9 = pneg %p2545_p7 }
 0x94a   : > { %p2552_p13 = por %p2551_p11, %p2550_p6 }
 0x94c   : > { %p2553_p8 = pnand %p2552_p13, %p2546_p9 }
 0x94e   : > { %2556 = shalt.err (!%p2553_p8)
}
 0x94f   : > { %s2603_s22 = smov 256   ;;  %s2604_s29 = smov 16  }
 0x950   : > { %2247 = dma.vmem_to_hbm [thread:$0]  (%p3854_p12), %s3662_s26, 512, %s3669_s19, %s1992_s21, %s2603_s22, %s2603_s22, %s2604_s29  }
 0x951 PF: > { %s3855_s30 = sld [smem:[#allocation11_spill]]  ;;  %s2020_s25 = sand.u32 1, %s2583_s17  }
 0x952   : > { %p3857_p0 = scmp.ge.s32.totalorder %s2595_s20, 2  ;;  %s2021_s13 = scalar_lea.sflag [#allocation4], %s2020_s25 }
 0x957   : > { %p3856_p10 = scmp.ne.s32.totalorder %s3855_s30, 0 }
 0x959   : > { %p2254_p2 = pnand %p3857_p0, %p3856_p10 }
 0x95b   : > { %2578 = dma.done.wait (!%p2254_p2), %s2021_s13, 512  }
 0x95c   : > { %2580 = vsyncadd (!%p2254_p2), %s2021_s13, 4294966784  ;;  %s3858_s20 = sld [smem:[#allocation9_spill]]  ;;  %s3859_s24 = sld [smem:[#allocation8_spill]] }
 0x95d   : > { %s3860_s19 = sld [smem:[#allocation10_spill]]  ;;  %s3861_s17 = smov %s2587_s18 }
 0x962   : > { %p24_p4 = scmp.ge.s32.totalorder %s3858_s20, 4   ;;  %s3862_s18 = smov %s3859_s24 }
 0x964   :  { %26 = sbr.rel (!%p24_p4) target bundleno = 5 (0x5), region = 115 }
 0x96b   :  { %2026 = vsyncpa [#allocation3], 1 }
 0x96c   :  { %2028 = vsyncpa [#allocation3 + $0x1], 1 }
 0x96d   :  { %2029 = vsyncpa [#allocation4], 1 }
 0x96e   :  { %2031 = vsyncpa [#allocation4 + $0x1], 1 }

</bundles_post_ra>
